<compile_context>
chip_gen: v7x
topology: tpu7x:2x2x1
jax: 0.10.0
libtpu: 0.0.40
codegen_flags: <defaults>
</compile_context>

<pallas_src>
import functools

import jax
import jax.numpy as jnp
from jax import lax
from jax.experimental import pallas as pl
from jax.experimental.pallas import tpu as pltpu

K2D = (1, 3, 3)
K3D = (3, 3, 3)
_EPS = 1e-5
_LANE = 128
_Q_CAP = 16384            # hard cap on the spatial tile (lanes)


def _round_up(x, m):
    return (x + m - 1) // m * m


@functools.lru_cache(maxsize=1)
def _vmem_budget():
    """(vmem_limit_bytes, tile_sizing_budget_bytes), generation aware."""
    cap = None
    try:
        info = pltpu.get_tpu_info()
        cap = getattr(info, "vmem_capacity_bytes", None)
    except Exception:
        cap = None
    if not cap:
        cap = 64 * 1024 * 1024            # conservative default (v7x per-core VMEM)
    vmem_limit = int(min(cap * 0.6, 100 * 1024 * 1024))
    budget = int(vmem_limit * 0.7)
    return vmem_limit, budget


def _estimate_vmem_bytes(q_tile, halo_w, cin_pad, cout, K):
    """Rough per-step VMEM footprint for the conv kernels."""
    bf = 2
    xin = 2 * cin_pad * q_tile * bf            # main input block (double buffered)
    xhalo = 2 * cin_pad * halo_w * bf
    msk = 2 * q_tile * bf
    wgt = 2 * cout * K * cin_pad * bf
    outb = 2 * cout * q_tile * bf
    cat = cin_pad * (q_tile + halo_w) * bf     # in-kernel concat temp
    stack = K * cin_pad * q_tile * bf          # folded-tap matmul operand
    acc = 2 * cout * q_tile * 4                # f32 conv result + norm temp
    return xin + xhalo + msk + wgt + outb + cat + stack + acc


# ----------------------------- Pallas kernels --------------------------------
def _conv_core(xa_ref, xh_ref, w_ref, b_ref, taps, q_tile):
    """One folded-tap MXU matmul: the K taps ride the contraction dimension."""
    x = jnp.concatenate([xa_ref[0], xh_ref[0]], axis=-1)      # (cin_pad, q_tile+halo)
    stack = jnp.concatenate([x[:, t:t + q_tile] for t in taps], axis=0)
    y = jnp.dot(w_ref[...], stack, preferred_element_type=jnp.float32)
    return y + b_ref[...]                                     # (Cout, q_tile) f32


def _conv_in_prelu_kernel(xa_ref, xh_ref, w_ref, b_ref, m_ref, a_ref, o_ref,
                          *, taps, q_tile, inv_m):
    """Single-tile path: conv + InstanceNorm3d + PReLU fully fused."""
    y = _conv_core(xa_ref, xh_ref, w_ref, b_ref, taps, q_tile)
    m = m_ref[...].astype(jnp.float32)                        # mask padded columns
    ym = y * m
    mean = jnp.sum(ym, axis=1, keepdims=True) * inv_m
    var = jnp.sum(ym * y, axis=1, keepdims=True) * inv_m - mean * mean
    yn = (y - mean) * lax.rsqrt(jnp.maximum(var, 0.0) + _EPS)
    alpha = a_ref[0]                                          # SMEM scalar
    o_ref[0] = jnp.where(yn >= 0.0, yn, alpha * yn).astype(o_ref.dtype)


def _conv_stats_kernel(xa_ref, xh_ref, w_ref, b_ref, m_ref, y_ref, st_ref,
                       *, taps, q_tile):
    """Tiled pass 1: conv tile + per-(sample, q_outer) partial sum / sumsq stats.

    Stats are only accumulated across the innermost ("arbitrary") q_inner axis;
    each q_outer gets its own partial block so q_outer may be "parallel" (v7x).
    """
    @pl.when(pl.program_id(2) == 0)
    def _():
        st_ref[...] = jnp.zeros(st_ref.shape, st_ref.dtype)

    y = _conv_core(xa_ref, xh_ref, w_ref, b_ref, taps, q_tile)
    m = m_ref[...].astype(jnp.float32)
    ym = y * m
    upd = jnp.concatenate([jnp.sum(ym, axis=1, keepdims=True),
                           jnp.sum(ym * y, axis=1, keepdims=True)], axis=1)
    st_ref[...] = st_ref[...] + upd[None, None, :, :]
    y_ref[0] = y.astype(y_ref.dtype)


def _norm_prelu_kernel(y_ref, st_ref, a_ref, o_ref, *, inv_m):
    """Tiled pass 2: reduce partial stats, apply InstanceNorm + PReLU."""
    st = jnp.sum(st_ref[0], axis=0)                           # (Cout, 2) f32
    mean = st[:, 0:1] * inv_m
    var = st[:, 1:2] * inv_m - mean * mean
    y = y_ref[0].astype(jnp.float32)
    yn = (y - mean) * lax.rsqrt(jnp.maximum(var, 0.0) + _EPS)
    alpha = a_ref[0]
    o_ref[0] = jnp.where(yn >= 0.0, yn, alpha * yn).astype(o_ref.dtype)


# --------------------------- fused conv wrapper -------------------------------
def conv3d_fused(x, w, b, alpha, padding, q_cap_lanes=None):
    """Conv3d(stride=1) + InstanceNorm3d + PReLU via Pallas (folded-tap matmul)."""
    N, Cin, D, H, W = x.shape
    Cout, _, kd, kh, kw = w.shape
    pd, ph, pw = padding
    Dp, Hp, Wp = D + 2 * pd, H + 2 * ph, W + 2 * pw
    K = kd * kh * kw

    # Flat tap offsets on the padded grid; same (a, b, c) order as the weight fold.
    taps = tuple(a * Hp * Wp + bb * Wp + c
                 for a in range(kd) for bb in range(kh) for c in range(kw))
    t_max = taps[-1]

    # Output positions laid on the padded (h, w) grid: q = d*Hp*Wp + h*Wp + w.
    q_total = D * Hp * Wp
    halo_w = _round_up(max(t_max, 1), _LANE)
    cin_pad = _round_up(max(Cin, 1), 16)           # bf16 packs 16 rows per sublane group

    vmem_limit, budget = _vmem_budget()

    def fits(qt):
        return _estimate_vmem_bytes(qt, halo_w, cin_pad, Cout, K) <= budget

    cap = q_cap_lanes if q_cap_lanes is not None else _Q_CAP
    cap_mult = max(1, cap // halo_w)
    needed = -(-q_total // halo_w)                 # halo_w multiples covering the sample
    if needed <= cap_mult and fits(needed * halo_w):
        mult = needed                              # whole sample fits one tile -> fused
    else:
        mult = min(max(needed - 1, 1), cap_mult)
        while mult > 1 and not fits(mult * halo_w):
            mult -= 1
    # TODO(synk): if even mult == 1 exceeds the VMEM budget (huge H*W planes where the
    # 3D halo is ~2*Hp*Wp lanes), switch to a D-slab layout with explicit halo DMA.
    q_tile = mult * halo_w
    nq = -(-q_total // q_tile)

    if nq == 1:
        NQO, NQI, nq_pad = 1, 1, 1
    else:
        # Split q for megacore (v7x): pad at most one extra (fully masked) block.
        NQO = 2 if (nq % 2 == 0 or nq >= 6) else 1
        NQI = -(-nq // NQO)
        nq_pad = NQO * NQI
    q_pad = nq_pad * q_tile
    HB = q_tile // halo_w
    flat_len = q_pad + halo_w
    assert flat_len >= Dp * Hp * Wp

    # Channels-first, flat, zero-padded bf16 input.
    xp = jnp.pad(x.astype(jnp.bfloat16),
                 ((0, 0), (0, cin_pad - Cin), (pd, pd), (ph, ph), (pw, pw)))
    xflat = xp.reshape(N, cin_pad, Dp * Hp * Wp)
    xflat = jnp.pad(xflat, ((0, 0), (0, 0), (0, flat_len - Dp * Hp * Wp)))

    # Weights folded over taps: (Cout, K*cin_pad) bf16; bias (Cout, 1) f32; alpha SMEM.
    w2 = jnp.transpose(w, (0, 2, 3, 4, 1))                    # (Cout, kd, kh, kw, Cin)
    w2 = jnp.pad(w2, ((0, 0), (0, 0), (0, 0), (0, 0), (0, cin_pad - Cin)))
    w2 = w2.reshape(Cout, K * cin_pad).astype(jnp.bfloat16)
    bias = b.reshape(Cout, 1).astype(jnp.float32)
    alpha_s = alpha.reshape(1).astype(jnp.float32)

    # Validity mask over the padded output grid (invalid: h>=H, w>=W, tail pad), bf16.
    qq = jnp.arange(q_pad, dtype=jnp.int32)
    valid = (qq < q_total) & (((qq // Wp) % Hp) < H) & ((qq % Wp) < W)
    mask = valid.astype(jnp.bfloat16).reshape(1, q_pad)

    inv_m = 1.0 / float(D * H * W)
    smem_spec = pl.BlockSpec(memory_space=pltpu.MemorySpace.SMEM)
    cost = pl.CostEstimate(
        flops=int(2 * N * q_pad * K * cin_pad * Cout),
        transcendentals=0,
        bytes_accessed=int(N * cin_pad * flat_len * 2 + Cout * K * cin_pad * 2
                           + 2 * N * Cout * q_pad * 2 + N * q_pad * 2))

    if nq_pad == 1:
        out = pl.pallas_call(
            functools.partial(_conv_in_prelu_kernel, taps=taps, q_tile=q_tile,
                              inv_m=inv_m),
            out_shape=jax.ShapeDtypeStruct((N, Cout, q_pad), jnp.bfloat16),
            grid=(N,),
            in_specs=[
                pl.BlockSpec((1, cin_pad, q_tile), lambda n: (n, 0, 0)),
                pl.BlockSpec((1, cin_pad, halo_w), lambda n: (n, 0, HB)),
                pl.BlockSpec((Cout, K * cin_pad), lambda n: (0, 0)),
                pl.BlockSpec((Cout, 1), lambda n: (0, 0)),
                pl.BlockSpec((1, q_tile), lambda n: (0, 0)),
                smem_spec],
            out_specs=pl.BlockSpec((1, Cout, q_tile), lambda n: (n, 0, 0)),
            compiler_params=pltpu.CompilerParams(
                dimension_semantics=("parallel",),
                vmem_limit_bytes=vmem_limit),
            cost_estimate=cost,
        )(xflat, xflat, w2, bias, mask, alpha_s)
    else:
        y, st = pl.pallas_call(
            functools.partial(_conv_stats_kernel, taps=taps, q_tile=q_tile),
            out_shape=(jax.ShapeDtypeStruct((N, Cout, q_pad), jnp.bfloat16),
                       jax.ShapeDtypeStruct((N, NQO, Cout, 2), jnp.float32)),
            grid=(N, NQO, NQI),
            in_specs=[
                pl.BlockSpec((1, cin_pad, q_tile),
                             lambda n, qo, qi: (n, 0, qo * NQI + qi)),
                pl.BlockSpec((1, cin_pad, halo_w),
                             lambda n, qo, qi: (n, 0, (qo * NQI + qi + 1) * HB)),
                pl.BlockSpec((Cout, K * cin_pad), lambda n, qo, qi: (0, 0)),
                pl.BlockSpec((Cout, 1), lambda n, qo, qi: (0, 0)),
                pl.BlockSpec((1, q_tile), lambda n, qo, qi: (0, qo * NQI + qi))],
            out_specs=(pl.BlockSpec((1, Cout, q_tile),
                                    lambda n, qo, qi: (n, 0, qo * NQI + qi)),
                       pl.BlockSpec((1, 1, Cout, 2),
                                    lambda n, qo, qi: (n, qo, 0, 0))),
            compiler_params=pltpu.CompilerParams(
                dimension_semantics=("parallel", "parallel", "arbitrary"),
                vmem_limit_bytes=vmem_limit),
            cost_estimate=cost,
        )(xflat, xflat, w2, bias, mask)

        out = pl.pallas_call(
            functools.partial(_norm_prelu_kernel, inv_m=inv_m),
            out_shape=jax.ShapeDtypeStruct((N, Cout, q_pad), jnp.bfloat16),
            grid=(N, nq_pad),
            in_specs=[pl.BlockSpec((1, Cout, q_tile), lambda n, q: (n, 0, q)),
                      pl.BlockSpec((1, NQO, Cout, 2), lambda n, q: (n, 0, 0, 0)),
                      smem_spec],
            out_specs=pl.BlockSpec((1, Cout, q_tile), lambda n, q: (n, 0, q)),
            input_output_aliases={0: 0},                       # normalize y in place
            compiler_params=pltpu.CompilerParams(
                dimension_semantics=("parallel", "parallel"),
                vmem_limit_bytes=vmem_limit),
        )(y, st, alpha_s)

    # Crop the padded (h, w) columns and restore NCDHW (bf16 activations).
    out = out[:, :, :q_total].reshape(N, Cout, D, Hp, Wp)[:, :, :, :H, :W]
    return out


def conv1x1_head(x, w, b):
    # 1x1x1 Conv3d, no norm/activation: left to XLA (lane width = num_classes is too
    # small to be worth a Pallas kernel).
    y = jnp.einsum('ncdhw,kc->nkdhw', x, w[:, :, 0, 0, 0],
                   preferred_element_type=jnp.float32)
    return y + b.reshape(1, -1, 1, 1, 1)


# ------------------------------ JAX glue ops ---------------------------------
def maxpool3d(x, ksize):
    # TODO(synk): fuse this pool into the conv kernel epilogue to save an HBM round trip.
    return lax.reduce_window(
        x, jnp.array(-jnp.inf, x.dtype), lax.max,
        window_dimensions=(1, 1) + tuple(ksize),
        window_strides=(1, 1) + tuple(ksize),
        padding="VALID")


def trilinear_resize(x, size):
    # PyTorch F.interpolate(mode='trilinear', align_corners=False); always upsampling.
    N, C = x.shape[:2]
    return jax.image.resize(x, (N, C) + tuple(size), method="trilinear")


# ------------------------------ parameters -----------------------------------
def _init_conv_params(key, cin, cout, ksize):
    kw_, kb_ = jax.random.split(key)
    fan_in = cin * ksize[0] * ksize[1] * ksize[2]
    w = jax.random.normal(kw_, (cout, cin) + tuple(ksize), jnp.float32) / jnp.sqrt(fan_in)
    b = 0.01 * jax.random.normal(kb_, (cout,), jnp.float32)
    a = jnp.full((1,), 0.25, jnp.float32)  # PReLU default init
    return {"w": w, "b": b, "a": a}


def _init_convblock(key, cin, cout, ksize):
    k1, k2 = jax.random.split(key)
    return [_init_conv_params(k1, cin, cout, ksize),
            _init_conv_params(k2, cout, cout, ksize)]


def _apply_convblock(params, x, ksize):
    pad = tuple((k - 1) // 2 for k in ksize)
    x = conv3d_fused(x, params[0]["w"], params[0]["b"], params[0]["a"], pad)
    x = conv3d_fused(x, params[1]["w"], params[1]["b"], params[1]["a"], pad)
    return x


def _init_down(key, cin, cout):
    k1, k2 = jax.random.split(key)
    return {"b2d": _init_convblock(k1, cin, cout, K2D),
            "b3d": _init_convblock(k2, cin, cout, K3D)}


def _apply_down(params, x, mtp):
    if isinstance(x, (list, tuple)):
        x = jnp.concatenate(x, axis=1)
    conv2d = _apply_convblock(params["b2d"], x, K2D)
    pool2d = maxpool3d(conv2d, (1, 2, 2))
    conv3d = _apply_convblock(params["b3d"], x, K3D)
    if conv3d.shape[2] >= mtp:
        pool3d = maxpool3d(conv3d, (2, 2, 2))
    else:
        pool3d = maxpool3d(conv3d, (1, 2, 2))
    return conv2d, pool2d, conv3d, pool3d


def _init_bottleneck(key, cin, cout, mode):
    if mode == "both":
        k1, k2 = jax.random.split(key)
        return {"b2d": _init_convblock(k1, cin, cout, K2D),
                "b3d": _init_convblock(k2, cin, cout, K3D)}
    ks = K2D if mode == "2d" else K3D
    return {"b": _init_convblock(key, cin, cout, ks)}


def _apply_bottleneck(params, x, mode):
    if mode == "both":
        x = jnp.concatenate(x, axis=1)
        return (_apply_convblock(params["b2d"], x, K2D),
                _apply_convblock(params["b3d"], x, K3D))
    ks = K2D if mode == "2d" else K3D
    return _apply_convblock(params["b"], x, ks)


def _init_up(key, cin, cout, mode):
    if mode == "both":
        k1, k2 = jax.random.split(key)
        return {"b2d": _init_convblock(k1, cin, cout, K2D),
                "b3d": _init_convblock(k2, cin, cout, K3D)}
    ks = K2D if mode == "2d" else K3D
    return {"b": _init_convblock(key, cin, cout, ks)}


def _apply_up(params, x, mode):
    x2d, xskip2d, x3d, xskip3d = x
    tar = xskip2d.shape[2:]
    up2d = trilinear_resize(x2d, tar)
    up3d = trilinear_resize(x3d, tar)
    cat = jnp.concatenate([up2d, xskip2d, up3d, xskip3d], axis=1)
    if mode == "both":
        return (_apply_convblock(params["b2d"], cat, K2D),
                _apply_convblock(params["b3d"], cat, K3D))
    ks = K2D if mode == "2d" else K3D
    return _apply_convblock(params["b"], cat, ks)


def init_mnet(key, num_classes, channels=(8, 8, 8, 8, 8)):
    keys = iter(jax.random.split(key, 40))
    c = channels
    p = {}
    p["down11"] = _init_down(next(keys), 1, c[0])
    p["down12"] = _init_down(next(keys), c[0], c[1])
    p["down13"] = _init_down(next(keys), c[1], c[2])
    p["down14"] = _init_down(next(keys), c[2], c[3])
    p["bottleneck1"] = _init_bottleneck(next(keys), c[3], c[4], "2d")
    p["up11"] = _init_up(next(keys), 2 * c[3] + 2 * c[4], c[3], "2d")
    p["up12"] = _init_up(next(keys), 2 * c[2] + 2 * c[3], c[2], "2d")
    p["up13"] = _init_up(next(keys), 2 * c[1] + 2 * c[2], c[1], "2d")
    p["up14"] = _init_up(next(keys), 2 * c[0] + 2 * c[1], c[0], "both")
    p["down21"] = _init_down(next(keys), c[0], c[1])
    p["down22"] = _init_down(next(keys), c[1] * 2, c[2])
    p["down23"] = _init_down(next(keys), c[2] * 2, c[3])
    p["bottleneck2"] = _init_bottleneck(next(keys), c[3] * 2, c[4], "both")
    p["up21"] = _init_up(next(keys), 2 * c[3] + 2 * c[4], c[3], "both")
    p["up22"] = _init_up(next(keys), 2 * c[2] + 2 * c[3], c[2], "both")
    p["up23"] = _init_up(next(keys), 2 * c[1] + 2 * c[2], c[1], "3d")
    p["down31"] = _init_down(next(keys), c[1], c[2])
    p["down32"] = _init_down(next(keys), c[2] * 2, c[3])
    p["bottleneck3"] = _init_bottleneck(next(keys), c[3] * 2, c[4], "both")
    p["up31"] = _init_up(next(keys), 2 * c[3] + 2 * c[4], c[3], "both")
    p["up32"] = _init_up(next(keys), 2 * c[2] + 2 * c[3], c[2], "3d")
    p["down41"] = _init_down(next(keys), c[2], c[3])
    p["bottleneck4"] = _init_bottleneck(next(keys), c[3] * 2, c[4], "both")
    p["up41"] = _init_up(next(keys), 2 * c[3] + 2 * c[4], c[3], "3d")
    p["bottleneck5"] = _init_bottleneck(next(keys), c[3], c[4], "3d")
    out_in = [c[0] * 2, c[1], c[1], c[2], c[2], c[3], c[3]]
    p["outputs"] = [_init_conv_params(next(keys), ci, num_classes, (1, 1, 1)) for ci in out_in]
    return p


def mnet_forward(params, x, mtp=8, if_ds=True):
    p = params
    down11 = _apply_down(p["down11"], x, mtp)
    down12 = _apply_down(p["down12"], down11[1], mtp)
    down13 = _apply_down(p["down13"], down12[1], mtp)
    down14 = _apply_down(p["down14"], down13[1], mtp)
    bn1 = _apply_bottleneck(p["bottleneck1"], down14[1], "2d")
    down21 = _apply_down(p["down21"], down11[3], mtp)
    down22 = _apply_down(p["down22"], [down21[1], down12[3]], mtp)
    down23 = _apply_down(p["down23"], [down22[1], down13[3]], mtp)
    bn2 = _apply_bottleneck(p["bottleneck2"], [down23[1], down14[3]], "both")
    down31 = _apply_down(p["down31"], down21[3], mtp)
    down32 = _apply_down(p["down32"], [down31[1], down22[3]], mtp)
    bn3 = _apply_bottleneck(p["bottleneck3"], [down32[1], down23[3]], "both")
    down41 = _apply_down(p["down41"], down31[3], mtp)
    bn4 = _apply_bottleneck(p["bottleneck4"], [down41[1], down32[3]], "both")
    bn5 = _apply_bottleneck(p["bottleneck5"], down41[3], "3d")
    up41 = _apply_up(p["up41"], [bn4[0], down41[0], bn5, down41[2]], "3d")
    up31 = _apply_up(p["up31"], [bn3[0], down32[0], bn4[1], down32[2]], "both")
    up32 = _apply_up(p["up32"], [up31[0], down31[0], up41, down31[2]], "3d")
    up21 = _apply_up(p["up21"], [bn2[0], down23[0], bn3[1], down23[2]], "both")
    up22 = _apply_up(p["up22"], [up21[0], down22[0], up31[1], down22[2]], "both")
    up23 = _apply_up(p["up23"], [up22[0], down21[0], up32, down21[2]], "3d")
    up11 = _apply_up(p["up11"], [bn1, down14[0], bn2[1], down14[2]], "2d")
    up12 = _apply_up(p["up12"], [up11, down13[0], up21[1], down13[2]], "2d")
    up13 = _apply_up(p["up13"], [up12, down12[0], up22[1], down12[2]], "2d")
    up14 = _apply_up(p["up14"], [up13, down11[0], up23, down11[2]], "both")

    def out_conv(op, feat):
        return conv1x1_head(feat, op["w"], op["b"])

    if if_ds:
        fmaps = [up11, up41, up12, up32, up13, up23,
                 jnp.concatenate(up14, axis=1)][::-1]
        return [out_conv(p["outputs"][i], fmaps[i]) for i in range(7)]
    return out_conv(p["outputs"][0], jnp.concatenate(up14, axis=1))


# ------------------------------ reference (test) ------------------------------
def _ref_conv_in_prelu(x, w, b, alpha, padding):
    """f32 reference (inputs rounded to bf16 to isolate kernel-structure error)."""
    xf = x.astype(jnp.bfloat16).astype(jnp.float32)
    wf = w.astype(jnp.bfloat16).astype(jnp.float32)
    y = lax.conv_general_dilated(xf, wf, (1, 1, 1),
                                 [(p, p) for p in padding],
                                 dimension_numbers=("NCDHW", "OIDHW", "NCDHW"))
    y = y + b.reshape(1, -1, 1, 1, 1)
    mean = y.mean(axis=(2, 3, 4), keepdims=True)
    var = y.var(axis=(2, 3, 4), keepdims=True)
    y = (y - mean) * lax.rsqrt(var + _EPS)
    return jnp.where(y >= 0.0, y, alpha.reshape(()) * y)


if __name__ == "__main__":
    key = jax.random.PRNGKey(0)
    kp, kx, k1, k2, k3 = jax.random.split(key, 5)

    # --- direct conv kernel checks (fused + tiled two-pass paths) vs reference ---
    xt = jax.random.normal(kx, (1, 4, 4, 8, 8), jnp.float32)
    at = jnp.full((1,), 0.25, jnp.float32)
    for ksz, pad, kk in ((K3D, (1, 1, 1), k1), (K2D, (0, 1, 1), k2)):
        kw_, kb_ = jax.random.split(kk)
        fan_in = 4 * ksz[0] * ksz[1] * ksz[2]
        wt = jax.random.normal(kw_, (6, 4) + ksz, jnp.float32) / jnp.sqrt(fan_in)
        bt = 0.01 * jax.random.normal(kb_, (6,), jnp.float32)
        ref = _ref_conv_in_prelu(xt, wt, bt, at, pad)
        got_fused = conv3d_fused(xt, wt, bt, at, pad).astype(jnp.float32)
        got_tiled = conv3d_fused(xt, wt, bt, at, pad,
                                 q_cap_lanes=128).astype(jnp.float32)
        md_f = float(jnp.max(jnp.abs(got_fused - ref)))
        md_t = float(jnp.max(jnp.abs(got_tiled - ref)))
        assert md_f < 0.1, f"fused conv mismatch: {md_f}"
        assert md_t < 0.1, f"tiled conv mismatch: {md_t}"

    # --- full MNet forward ---
    num_classes = 2
    channels = (8, 8, 8, 8, 8)          # small synthetic config (default is 48)
    params = init_mnet(kp, num_classes, channels)
    x = jax.random.normal(k3, (1, 1, 8, 16, 16), jnp.float32)  # NCDHW

    fwd = jax.jit(functools.partial(mnet_forward, mtp=8, if_ds=True))
    outs = fwd(params, x)
    outs = jax.block_until_ready(outs)

    assert len(outs) == 7
    assert outs[0].shape == (1, num_classes, 8, 16, 16)   # full-resolution head
    assert all(o.dtype == jnp.float32 for o in outs)
    print("KERNEL_OK")
</pallas_src>

<mosaic_0001>
module attributes {stable_mosaic.version = 11 : i64} {
  func.func @_conv_in_prelu_kernel(%arg0: i32, %arg1: memref<1x16x512xbf16, #tpu.memory_space<vmem>>, %arg2: memref<1x16x256xbf16, #tpu.memory_space<vmem>>, %arg3: memref<6x432xbf16, #tpu.memory_space<vmem>>, %arg4: memref<6x1xf32, #tpu.memory_space<vmem>>, %arg5: memref<1x512xbf16, #tpu.memory_space<vmem>>, %arg6: memref<1xf32, #tpu.memory_space<smem>>, %arg7: memref<1x6x512xbf16, #tpu.memory_space<vmem>>) attributes {dimension_semantics = [#tpu.dimension_semantics<parallel>], iteration_bounds = array<i64: 1>, scalar_prefetch = 0 : i64, scratch_operands = 0 : i64, tpu.core_type = #tpu.core_type<tc>, window_params = [{transform_indices = @transform_0, window_bounds = array<i64: 1, 16, 512>}, {transform_indices = @transform_1, window_bounds = array<i64: 1, 16, 256>}, {pipeline_mode = #tpu.pipeline_mode<synchronous>, transform_indices = @transform_2, window_bounds = array<i64: 6, 432>}, {pipeline_mode = #tpu.pipeline_mode<synchronous>, transform_indices = @transform_3, window_bounds = array<i64: 6, 1>}, {pipeline_mode = #tpu.pipeline_mode<synchronous>, transform_indices = @transform_4, window_bounds = array<i64: 1, 512>}, {transform_indices = @transform_5, window_bounds = array<i64: 1>}, {transform_indices = @transform_6, window_bounds = array<i64: 1, 6, 512>}]} {
    %c0 = arith.constant 0 : index
    %c0_0 = arith.constant 0 : index
    %c0_1 = arith.constant 0 : index
    %0 = vector.load %arg1[%c0, %c0_0, %c0_1] : memref<1x16x512xbf16, #tpu.memory_space<vmem>>, vector<1x16x512xbf16>
    %1 = vector.shape_cast %0 : vector<1x16x512xbf16> to vector<16x512xbf16>
    %c0_2 = arith.constant 0 : index
    %c0_3 = arith.constant 0 : index
    %c0_4 = arith.constant 0 : index
    %2 = vector.load %arg2[%c0_2, %c0_3, %c0_4] : memref<1x16x256xbf16, #tpu.memory_space<vmem>>, vector<1x16x256xbf16>
    %3 = vector.shape_cast %2 : vector<1x16x256xbf16> to vector<16x256xbf16>
    %4 = tpu.concatenate %1, %3 in 1 : vector<16x512xbf16>, vector<16x256xbf16> -> vector<16x768xbf16>
    %5 = vector.extract_strided_slice %4 {offsets = [0, 0], sizes = [16, 512], strides = [1, 1]} : vector<16x768xbf16> to vector<16x512xbf16>
    %6 = vector.extract_strided_slice %4 {offsets = [0, 1], sizes = [16, 512], strides = [1, 1]} : vector<16x768xbf16> to vector<16x512xbf16>
    %7 = vector.extract_strided_slice %4 {offsets = [0, 2], sizes = [16, 512], strides = [1, 1]} : vector<16x768xbf16> to vector<16x512xbf16>
    %8 = vector.extract_strided_slice %4 {offsets = [0, 10], sizes = [16, 512], strides = [1, 1]} : vector<16x768xbf16> to vector<16x512xbf16>
    %9 = vector.extract_strided_slice %4 {offsets = [0, 11], sizes = [16, 512], strides = [1, 1]} : vector<16x768xbf16> to vector<16x512xbf16>
    %10 = vector.extract_strided_slice %4 {offsets = [0, 12], sizes = [16, 512], strides = [1, 1]} : vector<16x768xbf16> to vector<16x512xbf16>
    %11 = vector.extract_strided_slice %4 {offsets = [0, 20], sizes = [16, 512], strides = [1, 1]} : vector<16x768xbf16> to vector<16x512xbf16>
    %12 = vector.extract_strided_slice %4 {offsets = [0, 21], sizes = [16, 512], strides = [1, 1]} : vector<16x768xbf16> to vector<16x512xbf16>
    %13 = vector.extract_strided_slice %4 {offsets = [0, 22], sizes = [16, 512], strides = [1, 1]} : vector<16x768xbf16> to vector<16x512xbf16>
    %14 = vector.extract_strided_slice %4 {offsets = [0, 100], sizes = [16, 512], strides = [1, 1]} : vector<16x768xbf16> to vector<16x512xbf16>
    %15 = vector.extract_strided_slice %4 {offsets = [0, 101], sizes = [16, 512], strides = [1, 1]} : vector<16x768xbf16> to vector<16x512xbf16>
    %16 = vector.extract_strided_slice %4 {offsets = [0, 102], sizes = [16, 512], strides = [1, 1]} : vector<16x768xbf16> to vector<16x512xbf16>
    %17 = vector.extract_strided_slice %4 {offsets = [0, 110], sizes = [16, 512], strides = [1, 1]} : vector<16x768xbf16> to vector<16x512xbf16>
    %18 = vector.extract_strided_slice %4 {offsets = [0, 111], sizes = [16, 512], strides = [1, 1]} : vector<16x768xbf16> to vector<16x512xbf16>
    %19 = vector.extract_strided_slice %4 {offsets = [0, 112], sizes = [16, 512], strides = [1, 1]} : vector<16x768xbf16> to vector<16x512xbf16>
    %20 = vector.extract_strided_slice %4 {offsets = [0, 120], sizes = [16, 512], strides = [1, 1]} : vector<16x768xbf16> to vector<16x512xbf16>
    %21 = vector.extract_strided_slice %4 {offsets = [0, 121], sizes = [16, 512], strides = [1, 1]} : vector<16x768xbf16> to vector<16x512xbf16>
    %22 = vector.extract_strided_slice %4 {offsets = [0, 122], sizes = [16, 512], strides = [1, 1]} : vector<16x768xbf16> to vector<16x512xbf16>
    %23 = vector.extract_strided_slice %4 {offsets = [0, 200], sizes = [16, 512], strides = [1, 1]} : vector<16x768xbf16> to vector<16x512xbf16>
    %24 = vector.extract_strided_slice %4 {offsets = [0, 201], sizes = [16, 512], strides = [1, 1]} : vector<16x768xbf16> to vector<16x512xbf16>
    %25 = vector.extract_strided_slice %4 {offsets = [0, 202], sizes = [16, 512], strides = [1, 1]} : vector<16x768xbf16> to vector<16x512xbf16>
    %26 = vector.extract_strided_slice %4 {offsets = [0, 210], sizes = [16, 512], strides = [1, 1]} : vector<16x768xbf16> to vector<16x512xbf16>
    %27 = vector.extract_strided_slice %4 {offsets = [0, 211], sizes = [16, 512], strides = [1, 1]} : vector<16x768xbf16> to vector<16x512xbf16>
    %28 = vector.extract_strided_slice %4 {offsets = [0, 212], sizes = [16, 512], strides = [1, 1]} : vector<16x768xbf16> to vector<16x512xbf16>
    %29 = vector.extract_strided_slice %4 {offsets = [0, 220], sizes = [16, 512], strides = [1, 1]} : vector<16x768xbf16> to vector<16x512xbf16>
    %30 = vector.extract_strided_slice %4 {offsets = [0, 221], sizes = [16, 512], strides = [1, 1]} : vector<16x768xbf16> to vector<16x512xbf16>
    %31 = vector.extract_strided_slice %4 {offsets = [0, 222], sizes = [16, 512], strides = [1, 1]} : vector<16x768xbf16> to vector<16x512xbf16>
    %32 = tpu.concatenate %5, %6, %7, %8, %9, %10, %11, %12, %13, %14, %15, %16, %17, %18, %19, %20 in 0 : vector<16x512xbf16>, vector<16x512xbf16>, vector<16x512xbf16>, vector<16x512xbf16>, vector<16x512xbf16>, vector<16x512xbf16>, vector<16x512xbf16>, vector<16x512xbf16>, vector<16x512xbf16>, vector<16x512xbf16>, vector<16x512xbf16>, vector<16x512xbf16>, vector<16x512xbf16>, vector<16x512xbf16>, vector<16x512xbf16>, vector<16x512xbf16> -> vector<256x512xbf16>
    %33 = tpu.concatenate %21, %22, %23, %24, %25, %26, %27, %28, %29, %30, %31 in 0 : vector<16x512xbf16>, vector<16x512xbf16>, vector<16x512xbf16>, vector<16x512xbf16>, vector<16x512xbf16>, vector<16x512xbf16>, vector<16x512xbf16>, vector<16x512xbf16>, vector<16x512xbf16>, vector<16x512xbf16>, vector<16x512xbf16> -> vector<176x512xbf16>
    %34 = tpu.concatenate %32, %33 in 0 : vector<256x512xbf16>, vector<176x512xbf16> -> vector<432x512xbf16>
    %c0_5 = arith.constant 0 : index
    %c0_6 = arith.constant 0 : index
    %35 = vector.load %arg3[%c0_5, %c0_6] : memref<6x432xbf16, #tpu.memory_space<vmem>>, vector<6x432xbf16>
    %cst = arith.constant dense<0.000000e+00> : vector<6x512xf32>
    %36 = tpu.matmul %35, %34, %cst {dimension_numbers = #tpu.dot_dimension_numbers<[1], [0], [0], [1], [0, 0, 1, 1], [], []>} : vector<6x432xbf16>, vector<432x512xbf16>, vector<6x512xf32> -> vector<6x512xf32>
    %c0_7 = arith.constant 0 : index
    %c0_8 = arith.constant 0 : index
    %37 = vector.load %arg4[%c0_7, %c0_8] : memref<6x1xf32, #tpu.memory_space<vmem>>, vector<6x1xf32>
    %38 = vector.broadcast %37 : vector<6x1xf32> to vector<6x512xf32>
    %39 = arith.addf %36, %38 : vector<6x512xf32>
    %c0_9 = arith.constant 0 : index
    %c0_10 = arith.constant 0 : index
    %40 = vector.load %arg5[%c0_9, %c0_10] : memref<1x512xbf16, #tpu.memory_space<vmem>>, vector<1x512xbf16>
    %41 = arith.extf %40 : vector<1x512xbf16> to vector<1x512xf32>
    %42 = vector.broadcast %41 : vector<1x512xf32> to vector<6x512xf32>
    %43 = arith.mulf %39, %42 : vector<6x512xf32>
    %cst_11 = arith.constant dense<0.000000e+00> : vector<6xf32>
    %44 = vector.multi_reduction <add>, %43, %cst_11 [1] : vector<6x512xf32> to vector<6xf32>
    %45 = vector.shape_cast %44 : vector<6xf32> to vector<6x1xf32>
    %cst_12 = arith.constant 3.906250e-03 : f32
    %46 = vector.broadcast %cst_12 : f32 to vector<6x1xf32>
    %47 = arith.mulf %45, %46 : vector<6x1xf32>
    %48 = arith.mulf %43, %39 : vector<6x512xf32>
    %cst_13 = arith.constant dense<0.000000e+00> : vector<6xf32>
    %49 = vector.multi_reduction <add>, %48, %cst_13 [1] : vector<6x512xf32> to vector<6xf32>
    %50 = vector.shape_cast %49 : vector<6xf32> to vector<6x1xf32>
    %cst_14 = arith.constant 3.906250e-03 : f32
    %51 = vector.broadcast %cst_14 : f32 to vector<6x1xf32>
    %52 = arith.mulf %50, %51 : vector<6x1xf32>
    %53 = arith.mulf %47, %47 : vector<6x1xf32>
    %54 = arith.subf %52, %53 : vector<6x1xf32>
    %55 = vector.broadcast %47 : vector<6x1xf32> to vector<6x512xf32>
    %56 = arith.subf %39, %55 : vector<6x512xf32>
    %cst_15 = arith.constant 0.000000e+00 : f32
    %57 = vector.broadcast %cst_15 : f32 to vector<6x1xf32>
    %58 = arith.maximumf %54, %57 : vector<6x1xf32>
    %cst_16 = arith.constant 9.99999974E-6 : f32
    %59 = vector.broadcast %cst_16 : f32 to vector<6x1xf32>
    %60 = arith.addf %58, %59 : vector<6x1xf32>
    %61 = math.rsqrt %60 : vector<6x1xf32>
    %62 = vector.broadcast %61 : vector<6x1xf32> to vector<6x512xf32>
    %63 = arith.mulf %56, %62 : vector<6x512xf32>
    %c0_17 = arith.constant 0 : index
    %64 = memref.load %arg6[%c0_17] : memref<1xf32, #tpu.memory_space<smem>>
    %cst_18 = arith.constant 0.000000e+00 : f32
    %65 = vector.broadcast %cst_18 : f32 to vector<6x512xf32>
    %66 = arith.cmpf oge, %63, %65 : vector<6x512xf32>
    %67 = vector.broadcast %64 : f32 to vector<6x512xf32>
    %68 = arith.mulf %67, %63 : vector<6x512xf32>
    %69 = arith.select %66, %63, %68 : vector<6x512xi1>, vector<6x512xf32>
    %70 = arith.truncf %69 : vector<6x512xf32> to vector<6x512xbf16>
    %c0_19 = arith.constant 0 : index
    %c0_20 = arith.constant 0 : index
    %c0_21 = arith.constant 0 : index
    %71 = vector.load %arg7[%c0_19, %c0_20, %c0_21] : memref<1x6x512xbf16, #tpu.memory_space<vmem>>, vector<1x6x512xbf16>
    %72 = vector.shape_cast %71 : vector<1x6x512xbf16> to vector<6x512xbf16>
    %73 = vector.shape_cast %70 : vector<6x512xbf16> to vector<1x6x512xbf16>
    tpu.vector_store %arg7[%c0_19, %c0_20, %c0_21], %73 {strides = array<i32>} : memref<1x6x512xbf16, #tpu.memory_space<vmem>>, vector<1x6x512xbf16>,
    return
  }
  func.func @transform_0(%arg0: i32) -> (i32, i32, i32) {
    %c0_i32 = arith.constant 0 : i32
    %c0_i32_0 = arith.constant 0 : i32
    %c0_i32_1 = arith.constant 0 : i32
    return %arg0, %c0_i32, %c0_i32_0 : i32, i32, i32
  }
  func.func @transform_1(%arg0: i32) -> (i32, i32, i32) {
    %c0_i32 = arith.constant 0 : i32
    %c2_i32 = arith.constant 2 : i32
    %c0_i32_0 = arith.constant 0 : i32
    return %arg0, %c0_i32, %c2_i32 : i32, i32, i32
  }
  func.func @transform_2(%arg0: i32) -> (i32, i32) {
    %c0_i32 = arith.constant 0 : i32
    %c0_i32_0 = arith.constant 0 : i32
    %c0_i32_1 = arith.constant 0 : i32
    return %c0_i32, %c0_i32_0 : i32, i32
  }
  func.func @transform_3(%arg0: i32) -> (i32, i32) {
    %c0_i32 = arith.constant 0 : i32
    %c0_i32_0 = arith.constant 0 : i32
    %c0_i32_1 = arith.constant 0 : i32
    return %c0_i32, %c0_i32_0 : i32, i32
  }
  func.func @transform_4(%arg0: i32) -> (i32, i32) {
    %c0_i32 = arith.constant 0 : i32
    %c0_i32_0 = arith.constant 0 : i32
    %c0_i32_1 = arith.constant 0 : i32
    return %c0_i32, %c0_i32_0 : i32, i32
  }
  func.func @transform_5(%arg0: i32) -> i32 {
    %c0_i32 = arith.constant 0 : i32
    %c0_i32_0 = arith.constant 0 : i32
    return %c0_i32 : i32
  }
  func.func @transform_6(%arg0: i32) -> (i32, i32, i32) {
    %c0_i32 = arith.constant 0 : i32
    %c0_i32_0 = arith.constant 0 : i32
    %c0_i32_1 = arith.constant 0 : i32
    return %arg0, %c0_i32, %c0_i32_0 : i32, i32, i32
  }
}

</mosaic_0001>

<bundles_post_ra>
// kernel: tpu_custom_call.1
= control target key start
LH: loop header
LB: loop body
LE: loop exit
PB: predicated region body
PF: predicated region fallthrough
CT: control target
= control target key end

     0   :  { %12 = vsyncpa [#allocation4], 0  ;;  %s1848_s0 = inlined_call_operand.hbm [shape: bf16[1,16,768], index: 0, kind: input, shape index: {}]   ;;  %s1849_s1 = inlined_call_operand.hbm [shape: bf16[1,16,768], index: 1, kind: input, shape index: {}]   ;;  %s1850_s2 = inlined_call_operand.vmem [shape: bf16[6,432], index: 2, kind: input, shape index: {}]   ;;  %s1851_s3 = inlined_call_operand.vmem [shape: f32[6,1], index: 3, kind: input, shape index: {}]   ;;  %s1852_s4 = inlined_call_operand.vmem [shape: bf16[1,512], index: 4, kind: input, shape index: {}]   ;;  %s1853_s5 = inlined_call_operand.<no memory space> [shape: f32[1], index: 5, kind: input, shape index: {}]   ;;  %s1854_s6 = inlined_call_operand.hbm [shape: bf16[1,6,512], index: 6, kind: output, shape index: {}]  }
   0x1   :  { %13 = vsyncpa [#allocation7], 0 }
   0x2   :  { %14 = vsyncpa [#allocation5], 0  ;;  %s1152_s21 = smov [#allocation3]   ;;  %s1077_s25 = scalar_lea.hbm %s1848_s0, 512 }
   0x3   :  { %s20_s22 = sshll.u32 %s1152_s21, 4  ;;  %p1078_p0 = scmp.ne.s32.totalorder %s1848_s0, %s1077_s25  ;;  %s21_s22 = int_to_ptr.vmem [resolvable:$true] %s20_s22 }
   0x4   :  { %s1079_s30 = scalar_lea.hbm %s1848_s0, 768  ;;  %p1081_p2 = scmp.lt.u32.totalorder %s1077_s25, %s1848_s0 }
   0x5   :  { %p1080_p1 = scmp.lt.u32.totalorder %s1079_s30, %s1077_s25 }
   0x7   :  { %p1082_p3 = por %p1081_p2, %p1080_p1 }
   0x9   :  { %p1083_p4 = pnand %p1082_p3, %p1078_p0 }
   0xb   :  { %1086 = shalt.err (!%p1083_p4)
}
   0xc   :  { %s1087_s9 = scalar_lea.vmem %s21_s22, 512  ;;  %p1092_p6 = scmp.lt.s32.totalorder %s21_s22, %s21_s22 }
   0xd   :  { %p1088_p5 = scmp.ne.s32.totalorder %s21_s22, %s1087_s9  ;;  %p1093_p7 = scmp.lt.s32.totalorder %s1087_s9, %s1087_s9 }
   0xf   :  { %p1094_p8 = por %p1093_p7, %p1092_p6 }
  0x11   :  { %p1095_p9 = pnand %p1094_p8, %p1088_p5 }
  0x13   :  { %1098 = shalt.err (!%p1095_p9)
}
  0x14   :  { %s1153_s10 = smov 384   ;;  %s1154_s11 = smov 256  }
  0x15   :  { %s1155_s12 = smov 16   ;;  %s32_s17 = scalar_lea.hbm %s1849_s1, 256 }
  0x16   :  { %26 = dma.hbm_to_vmem [thread:$0]  %s1848_s0, 512, %s21_s22, [#allocation4], %s1153_s10, %s1154_s11, %s1155_s12  }
  0x17   :  { %s1156_s18 = smov [#allocation6]   ;;  %s1123_s23 = scalar_lea.hbm %s1849_s1, 512 }
  0x18   :  { %s33_s19 = sshll.u32 %s1156_s18, 4  ;;  %p1100_p10 = scmp.ne.s32.totalorder %s32_s17, %s1123_s23  ;;  %s34_s19 = int_to_ptr.vmem [resolvable:$true] %s33_s19 }
  0x19   :  { %s1101_s26 = scalar_lea.hbm %s1849_s1, 768  ;;  %p1102_p11 = scmp.lt.u32.totalorder %s32_s17, %s1849_s1 }
  0x1a   :  { %p1103_p12 = scmp.lt.u32.totalorder %s1101_s26, %s1123_s23  ;;  %p1105_p0 = scmp.lt.u32.totalorder %s1123_s23, %s32_s17 }
  0x1c   :  { %p1104_p13 = por %p1103_p12, %p1102_p11 }
  0x1e   :  { %p1106_p1 = por %p1105_p0, %p1104_p13 }
  0x20   :  { %p1107_p2 = pnand %p1106_p1, %p1100_p10 }
  0x22   :  { %1110 = shalt.err (!%p1107_p2)
}
  0x23   :  { %s1111_s0 = scalar_lea.vmem %s34_s19, 256  ;;  %p1116_p4 = scmp.lt.s32.totalorder %s34_s19, %s34_s19 }
  0x24   :  { %p1112_p3 = scmp.ne.s32.totalorder %s34_s19, %s1111_s0  ;;  %p1117_p5 = scmp.lt.s32.totalorder %s1111_s0, %s1111_s0 }
  0x26   :  { %p1118_p6 = por %p1117_p5, %p1116_p4 }
  0x28   :  { %p1119_p7 = pnand %p1118_p6, %p1112_p3 }
  0x2a   :  { %1122 = shalt.err (!%p1119_p7)
}
  0x2b   :  { %s1157_s22 = smov 128   ;;  %s1158_s29 = smov 8  }
  0x2c   :  { %39 = dma.hbm_to_vmem [thread:$0]  %s32_s17, 256, %s34_s19, [#allocation7], %s1153_s10, %s1157_s22, %s1158_s29  }
  0x2d   :  { %1146 = dma.done.wait [#allocation4], 512  }
  0x2e   :  { %1147 = vsyncadd [#allocation4], 4294966784 }
  0x2f   :  { %1148 = dma.done.wait [#allocation7], 256  }
  0x30   :  { %1149 = vsyncadd [#allocation7], 4294967040  ;;  %v1248_v0 = vld [vmem:[#allocation3 + $0x4] ss:$16 sps:$4 sm:$0xff]   ;;  %v1250_v1 = vld [vmem:[#allocation3] ss:$16 sps:$4 sm:$0xff]  }
  0x31   :  { %s1159_s1 = smov 127   ;;  %v1253_v2 = vld [vmem:[#allocation3 + $0x8] ss:$16 sps:$4 sm:$0xff]   ;;  %v1255_v3 = vld [vmem:[#allocation3 + $0xc] ss:$16 sps:$4 sm:$0xff]   ;;  %709 = vmatprep.subr.bf16.mxu0 %v1248_v0  ;;  %s1160_s30 = smov 126  }
  0x32   :  { %91 = vrot.lane.b32.xlu0 %v1248_v0, %s1159_s1  ;;  %89 = vrot.lane.b32.xlu1 %v1250_v1, %s1159_s1  ;;  %v1263_v4 = vld [vmem:[#allocation6] ss:$8 sps:$4 sm:$0xff]   ;;  %s1161_s7 = smov 118   ;;  %s1162_s8 = smov 49   ;;  %v1282_v5 = vld [vmem:[#allocation6 + $0x4] ss:$8 sps:$4 sm:$0xff]  }
  0x33   :  { %710 = vmatpush1.bf16.msra.mxu0 %v1250_v1  ;;  %791 = vmatprep.subr.bf16.mxu1 %v1255_v3  ;;  %s1163_s9 = smov 117   ;;  %s1164_s10 = smov 48   ;;  %vm99_vm0 = vcmask 1039360   ;;  %vm118_vm1 = vcmask 1031168   ;;  %vm137_vm2 = vcmask 965632   ;;  %vm156_vm3 = vcmask 957440  }
  0x34   :  { %792 = vmatpush1.bf16.msra.mxu1 %v1253_v2  ;;  %s1165_s11 = smov 116   ;;  %s1166_s13 = smov 47   ;;  %vm175_vm4 = vcmask 949248   ;;  %vm194_vm5 = vcmask 883712   ;;  %vm213_vm6 = vcmask 875520   ;;  %vm232_vm7 = vcmask 867328  }
  0x35   :  { %s1167_s14 = smov 108   ;;  %s1168_s15 = smov 39   ;;  %vm384_vm8 = vcmask 400384   ;;  %vm399_vm9 = vcmask 392192   ;;  %vm251_vm10 = vcmask 228352   ;;  %vm414_vm11 = vcmask 384000  }
  0x36   :  { %93 = vrot.lane.b32.xlu0 %v1253_v2, %s1159_s1  ;;  %95 = vrot.lane.b32.xlu1 %v1255_v3, %s1159_s1  ;;  %s1169_s16 = smov 107   ;;  %s1170_s17 = smov 38   ;;  %vm429_vm12 = vcmask 318464   ;;  %vm270_vm13 = vcmask 220160   ;;  %vm444_vm14 = vcmask 310272   ;;  %vm289_vm15 = vcmask 211968  }
  0x37   :  { %s1171_s18 = smov 106   ;;  %s1172_s19 = smov 37  }
  0x38   :  { %s1173_s20 = smov 28   ;;  %s1174_s21 = smov 29  }
  0x39   :  { %s1175_s23 = smov 27   ;;  %s1176_s24 = smov 26  }
  0x3a   :  { %97 = vrot.lane.b32.xlu0 %v1263_v4, %s1159_s1  ;;  %110 = vrot.lane.b32.xlu1 %v1248_v0, %s1160_s30  ;;  %s1177_s25 = smov 18   ;;  %s1178_s26 = smov 17  }
  0x3e   :  { %112 = vrot.lane.b32.xlu0 %v1253_v2, %s1160_s30  ;;  %108 = vrot.lane.b32.xlu1 %v1250_v1, %s1160_s30 }
  0x42   :  { %114 = vrot.lane.b32.xlu0 %v1255_v3, %s1160_s30  ;;  %116 = vrot.lane.b32.xlu1 %v1263_v4, %s1160_s30 }
  0x46   :  { %129 = vrot.lane.b32.xlu0 %v1248_v0, %s1161_s7  ;;  %131 = vrot.lane.b32.xlu1 %v1253_v2, %s1161_s7 }
  0x4a   :  { %127 = vrot.lane.b32.xlu0 %v1250_v1, %s1161_s7  ;;  %374 = vrot.lane.b32.xlu1 %v1248_v0, %s1162_s8 }
  0x4e   :  { %376 = vrot.lane.b32.xlu0 %v1253_v2, %s1162_s8  ;;  %378 = vrot.lane.b32.xlu1 %v1255_v3, %s1162_s8 }
  0x52   :  { %133 = vrot.lane.b32.xlu0 %v1255_v3, %s1161_s7  ;;  %135 = vrot.lane.b32.xlu1 %v1263_v4, %s1161_s7  ;;  %s1181_s7 = smov [#allocation8]  }
  0x56   :  { %148 = vrot.lane.b32.xlu0 %v1248_v0, %s1163_s9  ;;  %150 = vrot.lane.b32.xlu1 %v1253_v2, %s1163_s9 }
  0x5a   :  { %380 = vrot.lane.b32.xlu0 %v1263_v4, %s1162_s8  ;;  %382 = vrot.lane.b32.xlu1 %v1282_v5, %s1162_s8  ;;  %s992_s8 = sshll.u32 %s1181_s7, 4  ;;  %s993_s8 = int_to_ptr.vmem [resolvable:$true] %s992_s8 }
  0x5b   :  { %p1129_p9 = scmp.lt.s32.totalorder %s993_s8, %s993_s8 }
  0x5e   :  { %146 = vrot.lane.b32.xlu0 %v1250_v1, %s1163_s9  ;;  %389 = vrot.lane.b32.xlu1 %v1248_v0, %s1164_s10 }
  0x62   :  { %391 = vrot.lane.b32.xlu0 %v1253_v2, %s1164_s10  ;;  %393 = vrot.lane.b32.xlu1 %v1255_v3, %s1164_s10 }
  0x66   :  { %152 = vrot.lane.b32.xlu0 %v1255_v3, %s1163_s9  ;;  %154 = vrot.lane.b32.xlu1 %v1263_v4, %s1163_s9 }
  0x6a   :  { %167 = vrot.lane.b32.xlu0 %v1248_v0, %s1165_s11  ;;  %169 = vrot.lane.b32.xlu1 %v1253_v2, %s1165_s11 }
  0x6e   :  { %395 = vrot.lane.b32.xlu0 %v1263_v4, %s1164_s10  ;;  %397 = vrot.lane.b32.xlu1 %v1282_v5, %s1164_s10 }
  0x72   :  { %165 = vrot.lane.b32.xlu0 %v1250_v1, %s1165_s11  ;;  %404 = vrot.lane.b32.xlu1 %v1248_v0, %s1166_s13 }
  0x76   :  { %406 = vrot.lane.b32.xlu0 %v1253_v2, %s1166_s13  ;;  %408 = vrot.lane.b32.xlu1 %v1255_v3, %s1166_s13 }
  0x7a   :  { %171 = vrot.lane.b32.xlu0 %v1255_v3, %s1165_s11  ;;  %173 = vrot.lane.b32.xlu1 %v1263_v4, %s1165_s11 }
  0x7e   :  { %186 = vrot.lane.b32.xlu0 %v1248_v0, %s1167_s14  ;;  %188 = vrot.lane.b32.xlu1 %v1253_v2, %s1167_s14 }
  0x82   :  { %410 = vrot.lane.b32.xlu0 %v1263_v4, %s1166_s13  ;;  %412 = vrot.lane.b32.xlu1 %v1282_v5, %s1166_s13 }
  0x86   :  { %184 = vrot.lane.b32.xlu0 %v1250_v1, %s1167_s14  ;;  %419 = vrot.lane.b32.xlu1 %v1248_v0, %s1168_s15 }
  0x8a   :  { %421 = vrot.lane.b32.xlu0 %v1253_v2, %s1168_s15  ;;  %423 = vrot.lane.b32.xlu1 %v1255_v3, %s1168_s15 }
  0x8e   :  { %190 = vrot.lane.b32.xlu0 %v1255_v3, %s1167_s14  ;;  %192 = vrot.lane.b32.xlu1 %v1263_v4, %s1167_s14 }
  0x92   :  { %205 = vrot.lane.b32.xlu0 %v1248_v0, %s1169_s16  ;;  %207 = vrot.lane.b32.xlu1 %v1253_v2, %s1169_s16 }
  0x96   :  { %425 = vrot.lane.b32.xlu0 %v1263_v4, %s1168_s15  ;;  %427 = vrot.lane.b32.xlu1 %v1282_v5, %s1168_s15 }
  0x9a   :  { %203 = vrot.lane.b32.xlu0 %v1250_v1, %s1169_s16  ;;  %434 = vrot.lane.b32.xlu1 %v1248_v0, %s1170_s17 }
  0x9e   :  { %436 = vrot.lane.b32.xlu0 %v1253_v2, %s1170_s17  ;;  %438 = vrot.lane.b32.xlu1 %v1255_v3, %s1170_s17 }
  0xa2   :  { %209 = vrot.lane.b32.xlu0 %v1255_v3, %s1169_s16  ;;  %211 = vrot.lane.b32.xlu1 %v1263_v4, %s1169_s16 }
  0xa4   :  { %v92_v6 = vpop.permute.xlu0 %91  ;;  %v90_v7 = vpop.permute.xlu1 %89 }
  0xa5   :  { %v1330_v11 = vsel %vm99_vm0, %v90_v7, %v92_v6 }
  0xa6   :  { %224 = vrot.lane.b32.xlu0 %v1248_v0, %s1171_s18  ;;  %226 = vrot.lane.b32.xlu1 %v1253_v2, %s1171_s18 }
  0xa8   :  { %v94_v8 = vpop.permute.xlu0 %93  ;;  %v96_v9 = vpop.permute.xlu1 %95 }
  0xa9   :  { %v1326_v10 = vsel %vm99_vm0, %v92_v6, %v94_v8  ;;  %v1342_v15 = vsel %vm99_vm0, %v94_v8, %v96_v9 }
  0xaa   :  { %440 = vrot.lane.b32.xlu0 %v1263_v4, %s1170_s17  ;;  %711 = vmatprep.subr.bf16.mxu0 %v1326_v10 }
  0xab   :  { %442 = vrot.lane.b32.xlu1 %v1282_v5, %s1170_s17  ;;  %712 = vmatpush1.bf16.msra.mxu0 %v1330_v11 }
  0xac   :  { %v1334_v12 = vpop.permute.xlu0 %97  ;;  %v111_v13 = vpop.permute.xlu1 %110 }
  0xad   :  { %v1337_v14 = vsel %vm99_vm0, %v96_v9, %v1334_v12  ;;  %vm459_vm0 = vcmask 302080  }
  0xae   :  { %222 = vrot.lane.b32.xlu0 %v1250_v1, %s1171_s18  ;;  %793 = vmatprep.subr.bf16.mxu1 %v1337_v14 }
  0xaf   :  { %449 = vrot.lane.b32.xlu1 %v1248_v0, %s1172_s19  ;;  %794 = vmatpush1.bf16.msra.mxu1 %v1342_v15 }
  0xb0   :  { %v113_v16 = vpop.permute.xlu0 %112  ;;  %v109_v17 = vpop.permute.xlu1 %108 }
  0xb1   :  { %v120_v18 = vsel %vm118_vm1, %v111_v13, %v113_v16  ;;  %v119_v19 = vsel %vm118_vm1, %v109_v17, %v111_v13 }
  0xb2   :  { %451 = vrot.lane.b32.xlu0 %v1253_v2, %s1172_s19  ;;  %713 = vmatprep.subr.bf16.mxu0 %v120_v18 }
  0xb3   :  { %453 = vrot.lane.b32.xlu1 %v1255_v3, %s1172_s19  ;;  %714 = vmatpush1.bf16.msra.mxu0 %v119_v19 }
  0xb4   :  { %v115_v20 = vpop.permute.xlu0 %114  ;;  %v117_v21 = vpop.permute.xlu1 %116 }
  0xb5   :  { %v121_v22 = vsel %vm118_vm1, %v113_v16, %v115_v20  ;;  %v122_v23 = vsel %vm118_vm1, %v115_v20, %v117_v21  ;;  %vm308_vm1 = vcmask 146432  }
  0xb6   :  { %228 = vrot.lane.b32.xlu0 %v1255_v3, %s1171_s18  ;;  %795 = vmatprep.subr.bf16.mxu1 %v122_v23 }
  0xb7   :  { %230 = vrot.lane.b32.xlu1 %v1263_v4, %s1171_s18  ;;  %796 = vmatpush1.bf16.msra.mxu1 %v121_v22 }
  0xb8   :  { %v130_v24 = vpop.permute.xlu0 %129  ;;  %v132_v25 = vpop.permute.xlu1 %131 }
  0xb9   :  { %v139_v26 = vsel %vm137_vm2, %v130_v24, %v132_v25 }
  0xba   :  { %243 = vrot.lane.b32.xlu0 %v1248_v0, %s1173_s20  ;;  %715 = vmatprep.subr.bf16.mxu0 %v139_v26 }
  0xbb   :  { %245 = vrot.lane.b32.xlu1 %v1253_v2, %s1173_s20 }
  0xbc   :  { %v128_v27 = vpop.permute.xlu0 %127  ;;  %v1364_v28 = vpop.permute.xlu1 %374 }
  0xbd   :  { %v138_v29 = vsel %vm137_vm2, %v128_v27, %v130_v24  ;;  %v1475_v27 = vld [vmem:[%s1850_s2] sm:$0x77] }
  0xbe   :  { %455 = vrot.lane.b32.xlu0 %v1263_v4, %s1172_s19  ;;  %716 = vmatpush1.bf16.msra.mxu0 %v138_v29 }
  0xbf   :  { %457 = vrot.lane.b32.xlu1 %v1282_v5, %s1172_s19 }
  0xc0   :  { %v1371_v30 = vpop.permute.xlu0 %376  ;;  %v1373_v31 = vpop.permute.xlu1 %378 }
  0xc2   :  { %241 = vrot.lane.b32.xlu0 %v1250_v1, %s1173_s20 }
  0xc3   :  { %464 = vrot.lane.b32.xlu1 %v1248_v0, %s1174_s21 }
  0xc4   :  { %v134_v32 = vpop.permute.xlu0 %133  ;;  %v136_v33 = vpop.permute.xlu1 %135 }
  0xc5   :  { %v140_v34 = vsel %vm137_vm2, %v132_v25, %v134_v32  ;;  %v141_v35 = vsel %vm137_vm2, %v134_v32, %v136_v33  ;;  %v1009_v32 = vcombine.high %v1475_v27, %v1475_v27  ;;  %vm474_vm2 = vcmask 236544  }
  0xc6   :  { %466 = vrot.lane.b32.xlu0 %v1253_v2, %s1174_s21  ;;  %797 = vmatprep.subr.bf16.mxu1 %v141_v35 }
  0xc7   :  { %468 = vrot.lane.b32.xlu1 %v1255_v3, %s1174_s21  ;;  %798 = vmatpush1.bf16.msra.mxu1 %v140_v34 }
  0xc8   :  { %v149_v36 = vpop.permute.xlu0 %148  ;;  %v151_v37 = vpop.permute.xlu1 %150  ;;  %741 = vmatprep.mubr.bf16.mxu0 %v1009_v32  ;;  %823 = vmatprep.mubr.bf16.mxu1 %v1009_v32 }
  0xc9   :  { %v158_v38 = vsel %vm156_vm3, %v149_v36, %v151_v37 }
  0xca   :  { %247 = vrot.lane.b32.xlu0 %v1255_v3, %s1173_s20  ;;  %717 = vmatprep.subr.bf16.mxu0 %v158_v38 }
  0xcb   :  { %249 = vrot.lane.b32.xlu1 %v1263_v4, %s1173_s20 }
  0xcc   :  { %v1387_v39 = vpop.permute.xlu0 %380  ;;  %v1389_v40 = vpop.permute.xlu1 %382 }
  0xce   :  { %262 = vrot.lane.b32.xlu0 %v1248_v0, %s1175_s23 }
  0xcf   :  { %264 = vrot.lane.b32.xlu1 %v1253_v2, %s1175_s23 }
  0xd0   :  { %v147_v41 = vpop.permute.xlu0 %146  ;;  %v1395_v42 = vpop.permute.xlu1 %389 }
  0xd1   :  { %v157_v43 = vsel %vm156_vm3, %v147_v41, %v149_v36 }
  0xd2   :  { %470 = vrot.lane.b32.xlu0 %v1263_v4, %s1174_s21  ;;  %718 = vmatpush1.bf16.msra.mxu0 %v157_v43 }
  0xd3   :  { %472 = vrot.lane.b32.xlu1 %v1282_v5, %s1174_s21 }
  0xd4   :  { %v1400_v44 = vpop.permute.xlu0 %391  ;;  %v1402_v45 = vpop.permute.xlu1 %393 }
  0xd6   :  { %260 = vrot.lane.b32.xlu0 %v1250_v1, %s1175_s23 }
  0xd7   :  { %266 = vrot.lane.b32.xlu1 %v1255_v3, %s1175_s23 }
  0xd8   :  { %v153_v46 = vpop.permute.xlu0 %152  ;;  %v155_v47 = vpop.permute.xlu1 %154 }
  0xd9   :  { %v159_v48 = vsel %vm156_vm3, %v151_v37, %v153_v46  ;;  %v160_v49 = vsel %vm156_vm3, %v153_v46, %v155_v47  ;;  %vm327_vm3 = vcmask 138240  }
  0xda   :  { %268 = vrot.lane.b32.xlu0 %v1263_v4, %s1175_s23  ;;  %799 = vmatprep.subr.bf16.mxu1 %v160_v49 }
  0xdb   :  { %281 = vrot.lane.b32.xlu1 %v1248_v0, %s1176_s24  ;;  %800 = vmatpush1.bf16.msra.mxu1 %v159_v48 }
  0xdc   :  { %v168_v50 = vpop.permute.xlu0 %167  ;;  %v170_v51 = vpop.permute.xlu1 %169 }
  0xdd   :  { %v177_v52 = vsel %vm175_vm4, %v168_v50, %v170_v51 }
  0xde   :  { %283 = vrot.lane.b32.xlu0 %v1253_v2, %s1176_s24  ;;  %719 = vmatprep.subr.bf16.mxu0 %v177_v52 }
  0xdf   :  { %479 = vrot.lane.b32.xlu1 %v1282_v5, %s1173_s20 }
  0xe0   :  { %v1417_v53 = vpop.permute.xlu0 %395  ;;  %v1419_v54 = vpop.permute.xlu1 %397 }
  0xe2   :  { %279 = vrot.lane.b32.xlu0 %v1250_v1, %s1176_s24 }
  0xe3   :  { %285 = vrot.lane.b32.xlu1 %v1255_v3, %s1176_s24 }
  0xe4   :  { %v166_v55 = vpop.permute.xlu0 %165  ;;  %v1423_v56 = vpop.permute.xlu1 %404 }
  0xe5   :  { %v176_v57 = vsel %vm175_vm4, %v166_v55, %v168_v50  ;;  %v387_v55 = vsel %vm384_vm8, %v1373_v31, %v1387_v39 }
  0xe6   :  { %287 = vrot.lane.b32.xlu0 %v1263_v4, %s1176_s24  ;;  %720 = vmatpush1.bf16.msra.mxu0 %v176_v57 }
  0xe7   :  { %300 = vrot.lane.b32.xlu1 %v1248_v0, %s1177_s25 }
  0xe8   :  { %v1428_v58 = vpop.permute.xlu0 %406  ;;  %v1430_v59 = vpop.permute.xlu1 %408 }
  0xea   :  { %302 = vrot.lane.b32.xlu0 %v1253_v2, %s1177_s25 }
  0xeb   :  { %482 = vrot.lane.b32.xlu1 %v1282_v5, %s1175_s23 }
  0xec   :  { %v172_v60 = vpop.permute.xlu0 %171  ;;  %v174_v61 = vpop.permute.xlu1 %173 }
  0xed   :  { %v178_v62 = vsel %vm175_vm4, %v170_v51, %v172_v60  ;;  %v179_v63 = vsel %vm175_vm4, %v172_v60, %v174_v61  ;;  %v388_v60 = vsel %vm384_vm8, %v1387_v39, %v1389_v40  ;;  %v401_v39 = vsel %vm399_vm9, %v1400_v44, %v1402_v45 }
  0xee   :  { %298 = vrot.lane.b32.xlu0 %v1250_v1, %s1177_s25  ;;  %801 = vmatprep.subr.bf16.mxu1 %v179_v63  ;;  %vm346_vm4 = vcmask 130048  }
  0xef   :  { %304 = vrot.lane.b32.xlu1 %v1255_v3, %s1177_s25  ;;  %802 = vmatpush1.bf16.msra.mxu1 %v178_v62 }
  0xf0   :  { %v187_v6 = vpop.permute.xlu0 %186  ;;  %v189_v7 = vpop.permute.xlu1 %188 }
  0xf1   :  { %v196_v8 = vsel %vm194_vm5, %v187_v6, %v189_v7 }
  0xf2   :  { %306 = vrot.lane.b32.xlu0 %v1263_v4, %s1177_s25  ;;  %721 = vmatprep.subr.bf16.mxu0 %v196_v8 }
  0xf3   :  { %319 = vrot.lane.b32.xlu1 %v1248_v0, %s1178_s26 }
  0xf4   :  { %v1442_v5 = vpop.permute.xlu0 %410  ;;  %v1444_v9 = vpop.permute.xlu1 %412 }
  0xf6   :  { %321 = vrot.lane.b32.xlu0 %v1253_v2, %s1178_s26 }
  0xf7   :  { %317 = vrot.lane.b32.xlu1 %v1250_v1, %s1178_s26 }
  0xf8   :  { %v185_v13 = vpop.permute.xlu0 %184  ;;  %v1448_v16 = vpop.permute.xlu1 %419 }
  0xf9   :  { %v195_v17 = vsel %vm194_vm5, %v185_v13, %v187_v6  ;;  %v403_v13 = vsel %vm399_vm9, %v1417_v53, %v1419_v54 }
  0xfa   :  { %323 = vrot.lane.b32.xlu0 %v1255_v3, %s1178_s26  ;;  %722 = vmatpush1.bf16.msra.mxu0 %v195_v17 }
  0xfb   :  { %325 = vrot.lane.b32.xlu1 %v1263_v4, %s1178_s26 }
  0xfc   :  { %v1453_v18 = vpop.permute.xlu0 %421  ;;  %v1455_v19 = vpop.permute.xlu1 %423 }
  0xfe   :  { %338 = vrot.lane.b32.xlu0 %v1248_v0, %s1155_s12 }
  0xff   :  { %340 = vrot.lane.b32.xlu1 %v1253_v2, %s1155_s12 }
 0x100   :  { %v191_v20 = vpop.permute.xlu0 %190  ;;  %v193_v21 = vpop.permute.xlu1 %192 }
 0x101   :  { %v197_v22 = vsel %vm194_vm5, %v189_v7, %v191_v20  ;;  %v198_v23 = vsel %vm194_vm5, %v191_v20, %v193_v21  ;;  %v402_v7 = vsel %vm399_vm9, %v1402_v45, %v1417_v53  ;;  %v415_v45 = vsel %vm414_vm11, %v1423_v56, %v1428_v58 }
 0x102   :  { %336 = vrot.lane.b32.xlu0 %v1250_v1, %s1155_s12  ;;  %803 = vmatprep.subr.bf16.mxu1 %v198_v23  ;;  %v416_v53 = vsel %vm414_vm11, %v1428_v58, %v1430_v59  ;;  %v417_v21 = vsel %vm414_vm11, %v1430_v59, %v1442_v5  ;;  %v430_v59 = vsel %vm429_vm12, %v1448_v16, %v1453_v18  ;;  %vm365_vm5 = vcmask 64512  }
 0x103   :  { %342 = vrot.lane.b32.xlu1 %v1255_v3, %s1155_s12  ;;  %804 = vmatpush1.bf16.msra.mxu1 %v197_v22 }
 0x104   :  { %v206_v24 = vpop.permute.xlu0 %205  ;;  %v208_v25 = vpop.permute.xlu1 %207 }
 0x105   :  { %v215_v26 = vsel %vm213_vm6, %v206_v24, %v208_v25 }
 0x106   :  { %344 = vrot.lane.b32.xlu0 %v1263_v4, %s1155_s12  ;;  %723 = vmatprep.subr.bf16.mxu0 %v215_v26  ;;  %s1179_s12 = smov 7  }
 0x107   :  { %357 = vrot.lane.b32.xlu1 %v1248_v0, %s1158_s29 }
 0x108   :  { %v1477_v29 = vpop.permute.xlu0 %425  ;;  %v1481_v33 = vpop.permute.xlu1 %427 }
 0x10a   :  { %359 = vrot.lane.b32.xlu0 %v1253_v2, %s1158_s29 }
 0x10b   :  { %355 = vrot.lane.b32.xlu1 %v1250_v1, %s1158_s29 }
 0x10c   :  { %v204_v34 = vpop.permute.xlu0 %203  ;;  %v1487_v35 = vpop.permute.xlu1 %434 }
 0x10d   :  { %v214_v36 = vsel %vm213_vm6, %v204_v34, %v206_v24  ;;  %v432_v34 = vsel %vm429_vm12, %v1455_v19, %v1477_v29 }
 0x10e   :  { %361 = vrot.lane.b32.xlu0 %v1255_v3, %s1158_s29  ;;  %724 = vmatpush1.bf16.msra.mxu0 %v214_v36 }
 0x10f   :  { %363 = vrot.lane.b32.xlu1 %v1263_v4, %s1158_s29 }
 0x110   :  { %v1494_v37 = vpop.permute.xlu0 %436  ;;  %v1496_v38 = vpop.permute.xlu1 %438 }
 0x112   :  { %487 = vrot.lane.b32.xlu0 %v1248_v0, %s1179_s12 }
 0x113   :  { %489 = vrot.lane.b32.xlu1 %v1253_v2, %s1179_s12 }
 0x114   :  { %v210_v41 = vpop.permute.xlu0 %209  ;;  %v212_v43 = vpop.permute.xlu1 %211 }
 0x115   :  { %v216_v46 = vsel %vm213_vm6, %v208_v25, %v210_v41  ;;  %v217_v47 = vsel %vm213_vm6, %v210_v41, %v212_v43  ;;  %v433_v41 = vsel %vm429_vm12, %v1477_v29, %v1481_v33  ;;  %v446_v29 = vsel %vm444_vm14, %v1494_v37, %v1496_v38 }
 0x116   :  { %485 = vrot.lane.b32.xlu0 %v1250_v1, %s1179_s12  ;;  %805 = vmatprep.subr.bf16.mxu1 %v217_v47  ;;  %vm595_vm6 = vcmask 56320  }
 0x117   :  { %491 = vrot.lane.b32.xlu1 %v1255_v3, %s1179_s12  ;;  %806 = vmatpush1.bf16.msra.mxu1 %v216_v46 }
 0x118   :  { %v225_v48 = vpop.permute.xlu0 %224  ;;  %v227_v0 = vpop.permute.xlu1 %226 }
 0x119   :  { %v234_v2 = vsel %vm232_vm7, %v225_v48, %v227_v0 }
 0x11a   :  { %493 = vrot.lane.b32.xlu0 %v1263_v4, %s1179_s12  ;;  %725 = vmatprep.subr.bf16.mxu0 %v234_v2 }
 0x11b   :  { %497 = vrot.lane.b32.xlu1 %v1326_v10, %s1179_s12 }
 0x11c   :  { %v1513_v1 = vpop.permute.xlu0 %440 }
 0x11d   :  { %v1515_v49 = vpop.permute.xlu1 %442 }
 0x11e   :  { %499 = vrot.lane.b32.xlu0 %v1342_v15, %s1179_s12  ;;  %v386_v15 = vsel %vm384_vm8, %v1371_v30, %v1373_v31  ;;  %v448_v2 = vsel %vm444_vm14, %v1513_v1, %v1515_v49 }
 0x11f   :  { %495 = vrot.lane.b32.xlu1 %v1330_v11, %s1179_s12  ;;  %v385_v11 = vsel %vm384_vm8, %v1364_v28, %v1371_v30 }
 0x120   :  { %v223_v3 = vpop.permute.xlu0 %222 }
 0x121   :  { %v1521_v50 = vpop.permute.xlu1 %449  ;;  %v233_v4 = vsel %vm232_vm7, %v223_v3, %v225_v48 }
 0x122   :  { %501 = vrot.lane.b32.xlu0 %v1337_v14, %s1179_s12  ;;  %726 = vmatpush1.bf16.msra.mxu0 %v233_v4 }
 0x123   :  { %503 = vrot.lane.b32.xlu1 %v1334_v12, %s1179_s12 }
 0x124   :  { %v1528_v10 = vpop.permute.xlu0 %451 }
 0x125   :  { %v1530_v51 = vpop.permute.xlu1 %453 }
 0x126   :  { %507 = vrot.lane.b32.xlu0 %v385_v11, %s1179_s12 }
 0x127   :  { %509 = vrot.lane.b32.xlu1 %v386_v15, %s1179_s12  ;;  %v461_v15 = vsel %vm459_vm0, %v1528_v10, %v1530_v51 }
 0x128   :  { %v229_v14 = vpop.permute.xlu0 %228 }
 0x129   :  { %v231_v52 = vpop.permute.xlu1 %230  ;;  %v235_v12 = vsel %vm232_vm7, %v227_v0, %v229_v14 }
 0x12a   :  { %505 = vrot.lane.b32.xlu0 %v1364_v28, %s1179_s12  ;;  %v236_v57 = vsel %vm232_vm7, %v229_v14, %v231_v52  ;;  %v400_v28 = vsel %vm399_vm9, %v1395_v42, %v1400_v44  ;;  %vm916_vm7 = vcmask 1045504  }
 0x12b   :  { %511 = vrot.lane.b32.xlu1 %v387_v55, %s1179_s12  ;;  %807 = vmatprep.subr.bf16.mxu1 %v236_v57 }
 0x12c   :  { %808 = vmatpush1.bf16.msra.mxu1 %v235_v12  ;;  %v1548_v30 = vpop.permute.xlu0 %243 }
 0x12d   :  { %v246_v61 = vpop.permute.xlu1 %245 }
 0x12e   :  { %513 = vrot.lane.b32.xlu0 %v388_v60, %s1179_s12  ;;  %v1559_v31 = vsel %vm251_vm10, %v1548_v30, %v246_v61 }
 0x12f   :  { %517 = vrot.lane.b32.xlu1 %v400_v28, %s1179_s12  ;;  %727 = vmatprep.subr.bf16.mxu0 %v1559_v31 }
 0x130   :  { %v1563_v62 = vpop.permute.xlu0 %455 }
 0x131   :  { %v1565_v63 = vpop.permute.xlu1 %457  ;;  %v462_v12 = vsel %vm459_vm0, %v1530_v51, %v1563_v62 }
 0x132   :  { %519 = vrot.lane.b32.xlu0 %v401_v39, %s1179_s12  ;;  %v463_v55 = vsel %vm459_vm0, %v1563_v62, %v1565_v63 }
 0x133   :  { %515 = vrot.lane.b32.xlu1 %v1395_v42, %s1179_s12 }
 0x134   :  { %v242_v40 = vpop.permute.xlu0 %241 }
 0x135   :  { %v1573_v6 = vpop.permute.xlu1 %464  ;;  %v252_v8 = vsel %vm251_vm10, %v242_v40, %v1548_v30 }
 0x136   :  { %521 = vrot.lane.b32.xlu0 %v402_v7, %s1179_s12  ;;  %728 = vmatpush1.bf16.msra.mxu0 %v252_v8 }
 0x137   :  { %523 = vrot.lane.b32.xlu1 %v403_v13, %s1179_s12 }
 0x138   :  { %v1585_v42 = vpop.permute.xlu0 %466 }
 0x139   :  { %v1587_v44 = vpop.permute.xlu1 %468  ;;  %v475_v57 = vsel %vm474_vm2, %v1573_v6, %v1585_v42 }
 0x13a   :  { %527 = vrot.lane.b32.xlu0 %v415_v45, %s1179_s12 }
 0x13b   :  { %529 = vrot.lane.b32.xlu1 %v416_v53, %s1179_s12 }
 0x13c   :  { %v248_v54 = vpop.permute.xlu0 %247 }
 0x13d   :  { %v1597_v17 = vpop.permute.xlu1 %249  ;;  %v1600_v20 = vsel %vm251_vm10, %v246_v61, %v248_v54  ;;  %v476_v61 = vsel %vm474_vm2, %v1585_v42, %v1587_v44 }
 0x13e   :  { %525 = vrot.lane.b32.xlu0 %v1423_v56, %s1179_s12  ;;  %v1609_v22 = vsel %vm251_vm10, %v248_v54, %v1597_v17  ;;  %v418_v56 = vsel %vm414_vm11, %v1442_v5, %v1444_v9  ;;  %v431_v5 = vsel %vm429_vm12, %v1453_v18, %v1455_v19  ;;  %v445_v19 = vsel %vm444_vm14, %v1487_v35, %v1494_v37 }
 0x13f   :  { %531 = vrot.lane.b32.xlu1 %v417_v21, %s1179_s12  ;;  %809 = vmatprep.subr.bf16.mxu1 %v1609_v22  ;;  %v447_v37 = vsel %vm444_vm14, %v1496_v38, %v1513_v1 }
 0x140   :  { %810 = vmatpush1.bf16.msra.mxu1 %v1600_v20  ;;  %v1614_v58 = vpop.permute.xlu0 %262 }
 0x141   :  { %v265_v23 = vpop.permute.xlu1 %264 }
 0x142   :  { %533 = vrot.lane.b32.xlu0 %v418_v56, %s1179_s12  ;;  %v1625_v24 = vsel %vm270_vm13, %v1614_v58, %v265_v23 }
 0x143   :  { %537 = vrot.lane.b32.xlu1 %v430_v59, %s1179_s12  ;;  %729 = vmatprep.subr.bf16.mxu0 %v1625_v24 }
 0x144   :  { %v1629_v25 = vpop.permute.xlu0 %470 }
 0x145   :  { %v1631_v26 = vpop.permute.xlu1 %472  ;;  %v477_v39 = vsel %vm474_vm2, %v1587_v44, %v1629_v25 }
 0x146   :  { %539 = vrot.lane.b32.xlu0 %v431_v5, %s1179_s12  ;;  %v478_v8 = vsel %vm474_vm2, %v1629_v25, %v1631_v26 }
 0x147   :  { %535 = vrot.lane.b32.xlu1 %v1448_v16, %s1179_s12 }
 0x148   :  { %v261_v9 = vpop.permute.xlu0 %260 }
 0x149   :  { %v267_v32 = vpop.permute.xlu1 %266  ;;  %v271_v36 = vsel %vm270_vm13, %v261_v9, %v1614_v58  ;;  %v1757_v9 = vld [vmem:[%s1850_s2 + $0x8] sm:$0x77] }
 0x14a   :  { %541 = vrot.lane.b32.xlu0 %v432_v34, %s1179_s12  ;;  %730 = vmatpush1.bf16.msra.mxu0 %v271_v36  ;;  %v1664_v33 = vsel %vm270_vm13, %v265_v23, %v267_v32 }
 0x14b   :  { %543 = vrot.lane.b32.xlu1 %v433_v41, %s1179_s12 }
 0x14c   :  { %v1649_v16 = vpop.permute.xlu0 %268 }
 0x14d   :  { %v282_v18 = vpop.permute.xlu1 %281  ;;  %v1656_v43 = vsel %vm270_vm13, %v267_v32, %v1649_v16  ;;  %v686_v32 = vld [vmem:[%s1851_s3] sm:$0x3f] }
 0x14e   :  { %547 = vrot.lane.b32.xlu0 %v445_v19, %s1179_s12  ;;  %811 = vmatprep.subr.bf16.mxu1 %v1656_v43  ;;  %v1011_v19 = vcombine.high %v1757_v9, %v1757_v9 }
 0x14f   :  { %549 = vrot.lane.b32.xlu1 %v446_v29, %s1179_s12  ;;  %812 = vmatpush1.bf16.msra.mxu1 %v1664_v33 }
 0x150   :  { %v284_v46 = vpop.permute.xlu0 %283 }
 0x151   :  { %v1668_v47 = vpop.permute.xlu1 %479  ;;  %v291_v48 = vsel %vm289_vm15, %v282_v18, %v284_v46 }
 0x152   :  { %545 = vrot.lane.b32.xlu0 %v1487_v35, %s1179_s12  ;;  %731 = vmatprep.subr.bf16.mxu0 %v291_v48  ;;  %v460_v35 = vsel %vm459_vm0, %v1521_v50, %v1528_v10 }
 0x153   :  { %551 = vrot.lane.b32.xlu1 %v447_v37, %s1179_s12 }
 0x154   :  { %v280_v0 = vpop.permute.xlu0 %279 }
 0x155   :  { %v286_v3 = vpop.permute.xlu1 %285  ;;  %v290_v4 = vsel %vm289_vm15, %v280_v0, %v282_v18  ;;  %v1008_v18 = vcombine.low %v1475_v27, %v1475_v27 }
 0x156   :  { %553 = vrot.lane.b32.xlu0 %v448_v2, %s1179_s12  ;;  %732 = vmatpush1.bf16.msra.mxu0 %v290_v4  ;;  %v292_v49 = vsel %vm289_vm15, %v284_v46, %v286_v3 }
 0x157   :  { %557 = vrot.lane.b32.xlu1 %v460_v35, %s1179_s12 }
 0x158   :  { %v288_v38 = vpop.permute.xlu0 %287 }
 0x159   :  { %v301_v11 = vpop.permute.xlu1 %300  ;;  %v293_v1 = vsel %vm289_vm15, %v286_v3, %v288_v38 }
 0x15a   :  { %559 = vrot.lane.b32.xlu0 %v461_v15, %s1179_s12  ;;  %813 = vmatprep.subr.bf16.mxu1 %v293_v1 }
 0x15b   :  { %555 = vrot.lane.b32.xlu1 %v1521_v50, %s1179_s12  ;;  %814 = vmatpush1.bf16.msra.mxu1 %v292_v49 }
 0x15c   :  { %v303_v14 = vpop.permute.xlu0 %302 }
 0x15d   :  { %v1694_v52 = vpop.permute.xlu1 %482  ;;  %v310_v10 = vsel %vm308_vm1, %v301_v11, %v303_v14 }
 0x15e   :  { %561 = vrot.lane.b32.xlu0 %v462_v12, %s1179_s12  ;;  %733 = vmatprep.subr.bf16.mxu0 %v310_v10 }
 0x15f   :  { %563 = vrot.lane.b32.xlu1 %v463_v55, %s1179_s12 }
 0x160   :  { %v299_v50 = vpop.permute.xlu0 %298 }
 0x161   :  { %v305_v60 = vpop.permute.xlu1 %304  ;;  %v309_v51 = vsel %vm308_vm1, %v299_v50, %v301_v11 }
 0x162   :  { %567 = vrot.lane.b32.xlu0 %v475_v57, %s1179_s12  ;;  %734 = vmatpush1.bf16.msra.mxu0 %v309_v51  ;;  %v311_v40 = vsel %vm308_vm1, %v303_v14, %v305_v60 }
 0x163   :  { %569 = vrot.lane.b32.xlu1 %v476_v61, %s1179_s12 }
 0x164   :  { %v307_v28 = vpop.permute.xlu0 %306 }
 0x165   :  { %v320_v62 = vpop.permute.xlu1 %319  ;;  %v312_v63 = vsel %vm308_vm1, %v305_v60, %v307_v28 }
 0x166   :  { %565 = vrot.lane.b32.xlu0 %v1573_v6, %s1179_s12  ;;  %815 = vmatprep.subr.bf16.mxu1 %v312_v63 }
 0x167   :  { %571 = vrot.lane.b32.xlu1 %v477_v39, %s1179_s12  ;;  %816 = vmatpush1.bf16.msra.mxu1 %v311_v40 }
 0x168   :  { %v322_v7 = vpop.permute.xlu0 %321 }
 0x169   :  { %v318_v13 = vpop.permute.xlu1 %317  ;;  %v329_v42 = vsel %vm327_vm3, %v320_v62, %v322_v7 }
 0x16a   :  { %573 = vrot.lane.b32.xlu0 %v478_v8, %s1179_s12  ;;  %735 = vmatprep.subr.bf16.mxu0 %v329_v42  ;;  %v328_v6 = vsel %vm327_vm3, %v318_v13, %v320_v62 }
 0x16b   :  { %577 = vrot.lane.b32.xlu1 %v1559_v31, %s1179_s12  ;;  %736 = vmatpush1.bf16.msra.mxu0 %v328_v6  ;;  %v481_v31 = vsel %vm251_vm10, %v1597_v17, %v1668_v47  ;;  %v1180_v17 = vmov 0  }
 0x16c   :  { %v324_v44 = vpop.permute.xlu0 %323  ;;  %1061 = vset.pattern.permute.xlu0 %v1180_v17  ;;  %1060 = vset.pattern.permute.xlu1 %v1180_v17 }
 0x16d   :  { %v326_v45 = vpop.permute.xlu1 %325  ;;  %v330_v53 = vsel %vm327_vm3, %v322_v7, %v324_v44 }
 0x16e   :  { %579 = vrot.lane.b32.xlu0 %v1600_v20, %s1179_s12  ;;  %v331_v54 = vsel %vm327_vm3, %v324_v44, %v326_v45 }
 0x16f   :  { %575 = vrot.lane.b32.xlu1 %v1548_v30, %s1179_s12  ;;  %817 = vmatprep.subr.bf16.mxu1 %v331_v54 }
 0x170   :  { %818 = vmatpush1.bf16.msra.mxu1 %v330_v53  ;;  %v339_v21 = vpop.permute.xlu0 %338 }
 0x171   :  { %v341_v56 = vpop.permute.xlu1 %340 }
 0x172   :  { %581 = vrot.lane.b32.xlu0 %v1609_v22, %s1179_s12  ;;  %v348_v23 = vsel %vm346_vm4, %v339_v21, %v341_v56 }
 0x173   :  { %583 = vrot.lane.b32.xlu1 %v481_v31, %s1179_s12  ;;  %737 = vmatprep.subr.bf16.mxu0 %v348_v23 }
 0x174   :  { %v337_v20 = vpop.permute.xlu0 %336 }
 0x175   :  { %v343_v59 = vpop.permute.xlu1 %342  ;;  %v347_v30 = vsel %vm346_vm4, %v337_v20, %v339_v21 }
 0x176   :  { %587 = vrot.lane.b32.xlu0 %v1625_v24, %s1179_s12  ;;  %738 = vmatpush1.bf16.msra.mxu0 %v347_v30  ;;  %v349_v5 = vsel %vm346_vm4, %v341_v56, %v343_v59 }
 0x177   :  { %589 = vrot.lane.b32.xlu1 %v1664_v33, %s1179_s12 }
 0x178   :  { %v345_v25 = vpop.permute.xlu0 %344 }
 0x179   :  { %v358_v22 = vpop.permute.xlu1 %357  ;;  %v350_v26 = vsel %vm346_vm4, %v343_v59, %v345_v25 }
 0x17a   :  { %585 = vrot.lane.b32.xlu0 %v1614_v58, %s1179_s12  ;;  %819 = vmatprep.subr.bf16.mxu1 %v350_v26  ;;  %v484_v58 = vsel %vm270_vm13, %v1649_v16, %v1694_v52 }
 0x17b   :  { %591 = vrot.lane.b32.xlu1 %v1656_v43, %s1179_s12  ;;  %820 = vmatpush1.bf16.msra.mxu1 %v349_v5 }
 0x17c   :  { %v360_v24 = vpop.permute.xlu0 %359 }
 0x17d   :  { %v356_v34 = vpop.permute.xlu1 %355  ;;  %v367_v36 = vsel %vm365_vm5, %v358_v22, %v360_v24 }
 0x17e   :  { %593 = vrot.lane.b32.xlu0 %v484_v58, %s1179_s12  ;;  %739 = vmatprep.subr.bf16.mxu0 %v367_v36  ;;  %v366_v41 = vsel %vm365_vm5, %v356_v34, %v358_v22 }
 0x17f   :  { %740 = vmatpush1.bf16.msra.mxu0 %v366_v41  ;;  %689 = vperm.xlu1 %1060, %v686_v32  }
 0x180   :  { %v362_v43 = vpop.permute.xlu0 %361 }
 0x181   :  { %v364_v29 = vpop.permute.xlu1 %363  ;;  %v368_v16 = vsel %vm365_vm5, %v360_v24, %v362_v43 }
 0x182   :  { %v369_v33 = vsel %vm365_vm5, %v362_v43, %v364_v29  ;;  %742 = vmatmul.mubr.bf16.vlgmr.msra.gmra.mrb[0].mxu0 %v1008_v18 }
 0x183   :  { %821 = vmatprep.subr.bf16.mxu1 %v369_v33  ;;  %1012 = vmatprep.mubr.msk.bf16.mxu0 %vm399_vm9, %v1011_v19 }
 0x184   :  { %822 = vmatpush1.bf16.msra.mxu1 %v368_v16  ;;  %v488_v46 = vpop.permute.xlu0 %487 }
 0x185   :  { %v490_v47 = vpop.permute.xlu1 %489 }
 0x186   :  { %v597_v27 = vsel %vm595_vm6, %v488_v46, %v490_v47 }
 0x187   :  { %750 = vmatprep.subr.bf16.mxu0 %v597_v27  ;;  %824 = vmatmul.mubr.bf16.vlgmr.msra.gmra.mrb[0].mxu1 %v1008_v18 }
 0x188   :  { %v486_v48 = vpop.permute.xlu0 %485  ;;  %1013 = vmatprep.mubr.msk.bf16.mxu1 %vm399_vm9, %v1011_v19 }
 0x189   :  { %v596_v37 = vsel %vm595_vm6, %v486_v48, %v488_v46  ;;  %v492_v0 = vpop.permute.xlu1 %491 }
 0x18a   :  { %751 = vmatpush1.bf16.msra.mxu0 %v596_v37  ;;  %v598_v35 = vsel %vm595_vm6, %v490_v47, %v492_v0 }
 0x18c   :  { %v494_v2 = vpop.permute.xlu0 %493 }
 0x18d   :  { %v498_v3 = vpop.permute.xlu1 %497  ;;  %v599_v4 = vsel %vm595_vm6, %v492_v0, %v494_v2 }
 0x18e   :  { %832 = vmatprep.subr.bf16.mxu1 %v599_v4 }
 0x18f   :  { %833 = vmatpush1.bf16.msra.mxu1 %v598_v35 }
 0x190   :  { %v500_v38 = vpop.permute.xlu0 %499 }
 0x191   :  { %v496_v11 = vpop.permute.xlu1 %495  ;;  %v601_v15 = vsel %vm595_vm6, %v498_v3, %v500_v38 }
 0x192   :  { %v600_v1 = vsel %vm595_vm6, %v496_v11, %v498_v3  ;;  %752 = vmatprep.subr.bf16.mxu0 %v601_v15 }
 0x193   :  { %753 = vmatpush1.bf16.msra.mxu0 %v600_v1 }
 0x194   :  { %v502_v49 = vpop.permute.xlu0 %501 }
 0x195   :  { %v602_v14 = vsel %vm595_vm6, %v500_v38, %v502_v49  ;;  %v504_v52 = vpop.permute.xlu1 %503 }
 0x196   :  { %v603_v12 = vsel %vm595_vm6, %v502_v49, %v504_v52 }
 0x197   :  { %834 = vmatprep.subr.bf16.mxu1 %v603_v12 }
 0x198   :  { %835 = vmatpush1.bf16.msra.mxu1 %v602_v14  ;;  %v508_v10 = vpop.permute.xlu0 %507 }
 0x199   :  { %v510_v55 = vpop.permute.xlu1 %509 }
 0x19a   :  { %v605_v50 = vsel %vm595_vm6, %v508_v10, %v510_v55 }
 0x19b   :  { %754 = vmatprep.subr.bf16.mxu0 %v605_v50 }
 0x19c   :  { %v506_v57 = vpop.permute.xlu0 %505 }
 0x19d   :  { %v604_v60 = vsel %vm595_vm6, %v506_v57, %v508_v10  ;;  %v512_v51 = vpop.permute.xlu1 %511 }
 0x19e   :  { %755 = vmatpush1.bf16.msra.mxu0 %v604_v60  ;;  %v606_v63 = vsel %vm595_vm6, %v510_v55, %v512_v51 }
 0x1a0   :  { %v514_v61 = vpop.permute.xlu0 %513 }
 0x1a1   :  { %v518_v28 = vpop.permute.xlu1 %517  ;;  %v607_v62 = vsel %vm595_vm6, %v512_v51, %v514_v61 }
 0x1a2   :  { %836 = vmatprep.subr.bf16.mxu1 %v607_v62 }
 0x1a3   :  { %837 = vmatpush1.bf16.msra.mxu1 %v606_v63 }
 0x1a4   :  { %v520_v39 = vpop.permute.xlu0 %519 }
 0x1a5   :  { %v516_v40 = vpop.permute.xlu1 %515  ;;  %v609_v7 = vsel %vm595_vm6, %v518_v28, %v520_v39 }
 0x1a6   :  { %v608_v8 = vsel %vm595_vm6, %v516_v40, %v518_v28  ;;  %756 = vmatprep.subr.bf16.mxu0 %v609_v7 }
 0x1a7   :  { %757 = vmatpush1.bf16.msra.mxu0 %v608_v8 }
 0x1a8   :  { %v522_v13 = vpop.permute.xlu0 %521 }
 0x1a9   :  { %v610_v42 = vsel %vm595_vm6, %v520_v39, %v522_v13  ;;  %v524_v6 = vpop.permute.xlu1 %523 }
 0x1aa   :  { %v611_v44 = vsel %vm595_vm6, %v522_v13, %v524_v6  ;;  %v1010_v13 = vcombine.low %v1757_v9, %v1757_v9 }
 0x1ab   :  { %838 = vmatprep.subr.bf16.mxu1 %v611_v44 }
 0x1ac   :  { %839 = vmatpush1.bf16.msra.mxu1 %v610_v42  ;;  %v528_v45 = vpop.permute.xlu0 %527 }
 0x1ad   :  { %v530_v53 = vpop.permute.xlu1 %529 }
 0x1ae   :  { %v613_v54 = vsel %vm595_vm6, %v528_v45, %v530_v53 }
 0x1af   :  { %758 = vmatprep.subr.bf16.mxu0 %v613_v54 }
 0x1b0   :  { %v526_v21 = vpop.permute.xlu0 %525 }
 0x1b1   :  { %v612_v56 = vsel %vm595_vm6, %v526_v21, %v528_v45  ;;  %v532_v31 = vpop.permute.xlu1 %531  ;;  %v873_v21 = vld [vmem:[%s1852_s4] sm:$0xf] }
 0x1b2   :  { %759 = vmatpush1.bf16.msra.mxu0 %v612_v56  ;;  %v614_v30 = vsel %vm595_vm6, %v530_v53, %v532_v31  ;;  %v876_v53 = vlaneseq  ;;  %v874_v56 = vunpack.c.l.bf16 %v873_v21 }
 0x1b4   :  { %v534_v23 = vpop.permute.xlu0 %533  ;;  %v877_v54 = vshrl.u32 %v876_v53, 7  ;;  %v959_v53 = vstv %s1853_s5  ;;  %s1124_s5 = scalar_lea.vmem %s993_s8, 256 }
 0x1b5   :  { %v538_v20 = vpop.permute.xlu1 %537  ;;  %v615_v59 = vsel %vm595_vm6, %v532_v31, %v534_v23  ;;  %p1125_p8 = scmp.ne.s32.totalorder %s993_s8, %s1124_s5  ;;  %p1130_p10 = scmp.lt.s32.totalorder %s1124_s5, %s1124_s5 }
 0x1b6   :  { %840 = vmatprep.subr.bf16.mxu1 %v615_v59  ;;  %v878_v31 = vsub.s32 0, %v877_v54  ;;  %v882_v9 = vsub.s32 2, %v877_v54  ;;  %v886_v59 = vsub.s32 4, %v877_v54 }
 0x1b7   :  { %841 = vmatpush1.bf16.msra.mxu1 %v614_v30  ;;  %v890_v30 = vsub.s32 6, %v877_v54  ;;  %p1131_p11 = por %p1130_p10, %p1129_p9 }
 0x1b8   :  { %v540_v17 = vpop.permute.xlu0 %539  ;;  %v879_v23 = vrot.slane %v874_v56, %v878_v31 }
 0x1b9   :  { %v536_v25 = vpop.permute.xlu1 %535  ;;  %v617_v22 = vsel %vm595_vm6, %v538_v20, %v540_v17  ;;  %p1132_p12 = pnand %p1131_p11, %p1125_p8 }
 0x1ba   :  { %v616_v26 = vsel %vm595_vm6, %v536_v25, %v538_v20  ;;  %760 = vmatprep.subr.bf16.mxu0 %v617_v22  ;;  %v883_v20 = vrot.slane %v874_v56, %v882_v9  ;;  %v899_v25 = vrot.slane %v879_v23, %v878_v31 }
 0x1bb   :  { %761 = vmatpush1.bf16.msra.mxu0 %v616_v26 }
 0x1bc   :  { %v542_v5 = vpop.permute.xlu0 %541  ;;  %v903_v26 = vrot.slane %v883_v20, %v878_v31 }
 0x1bd   :  { %v618_v24 = vsel %vm595_vm6, %v540_v17, %v542_v5  ;;  %v544_v32 = vpop.permute.xlu1 %543 }
 0x1be   :  { %v619_v58 = vsel %vm595_vm6, %v542_v5, %v544_v32  ;;  %v887_v5 = vrot.slane %v874_v56, %v886_v59 }
 0x1bf   :  { %842 = vmatprep.subr.bf16.mxu1 %v619_v58  ;;  %v891_v58 = vrot.slane %v874_v56, %v890_v30 }
 0x1c0   :  { %843 = vmatpush1.bf16.msra.mxu1 %v618_v24  ;;  %v548_v34 = vpop.permute.xlu0 %547 }
 0x1c1   :  { %v550_v36 = vpop.permute.xlu1 %549 }
 0x1c2   :  { %v621_v41 = vsel %vm595_vm6, %v548_v34, %v550_v36 }
 0x1c3   :  { %762 = vmatprep.subr.bf16.mxu0 %v621_v41 }
 0x1c4   :  { %v546_v18 = vpop.permute.xlu0 %545 }
 0x1c5   :  { %v620_v19 = vsel %vm595_vm6, %v546_v18, %v548_v34  ;;  %v552_v43 = vpop.permute.xlu1 %551 }
 0x1c6   :  { %763 = vmatpush1.bf16.msra.mxu0 %v620_v19  ;;  %v622_v46 = vsel %vm595_vm6, %v550_v36, %v552_v43 }
 0x1c8   :  { %v554_v29 = vpop.permute.xlu0 %553 }
 0x1c9   :  { %v558_v16 = vpop.permute.xlu1 %557  ;;  %v623_v33 = vsel %vm595_vm6, %v552_v43, %v554_v29  ;;  %v907_v43 = vrot.slane %v887_v5, %v878_v31 }
 0x1ca   :  { %844 = vmatprep.subr.bf16.mxu1 %v623_v33  ;;  %v911_v33 = vrot.slane %v891_v58, %v878_v31 }
 0x1cb   :  { %845 = vmatpush1.bf16.msra.mxu1 %v622_v46 }
 0x1cc   :  { %v560_v47 = vpop.permute.xlu0 %559 }
 0x1cd   :  { %v556_v27 = vpop.permute.xlu1 %555  ;;  %v625_v48 = vsel %vm595_vm6, %v558_v16, %v560_v47 }
 0x1ce   :  { %v624_v37 = vsel %vm595_vm6, %v556_v27, %v558_v16  ;;  %764 = vmatprep.subr.bf16.mxu0 %v625_v48 }
 0x1cf   :  { %765 = vmatpush1.bf16.msra.mxu0 %v624_v37 }
 0x1d0   :  { %v562_v0 = vpop.permute.xlu0 %561 }
 0x1d1   :  { %v626_v2 = vsel %vm595_vm6, %v560_v47, %v562_v0  ;;  %v564_v3 = vpop.permute.xlu1 %563 }
 0x1d2   :  { %v627_v4 = vsel %vm595_vm6, %v562_v0, %v564_v3 }
 0x1d3   :  { %846 = vmatprep.subr.bf16.mxu1 %v627_v4 }
 0x1d4   :  { %847 = vmatpush1.bf16.msra.mxu1 %v626_v2  ;;  %v568_v35 = vpop.permute.xlu0 %567 }
 0x1d5   :  { %v570_v38 = vpop.permute.xlu1 %569 }
 0x1d6   :  { %v629_v11 = vsel %vm595_vm6, %v568_v35, %v570_v38 }
 0x1d7   :  { %766 = vmatprep.subr.bf16.mxu0 %v629_v11 }
 0x1d8   :  { %v566_v15 = vpop.permute.xlu0 %565 }
 0x1d9   :  { %v628_v1 = vsel %vm595_vm6, %v566_v15, %v568_v35  ;;  %v572_v49 = vpop.permute.xlu1 %571 }
 0x1da   :  { %767 = vmatpush1.bf16.msra.mxu0 %v628_v1  ;;  %v630_v10 = vsel %vm595_vm6, %v570_v38, %v572_v49 }
 0x1dc   :  { %v574_v14 = vpop.permute.xlu0 %573 }
 0x1dd   :  { %v578_v52 = vpop.permute.xlu1 %577  ;;  %v631_v12 = vsel %vm595_vm6, %v572_v49, %v574_v14 }
 0x1de   :  { %848 = vmatprep.subr.bf16.mxu1 %v631_v12 }
 0x1df   :  { %849 = vmatpush1.bf16.msra.mxu1 %v630_v10 }
 0x1e0   :  { %v580_v55 = vpop.permute.xlu0 %579 }
 0x1e1   :  { %v576_v50 = vpop.permute.xlu1 %575  ;;  %v633_v57 = vsel %vm595_vm6, %v578_v52, %v580_v55 }
 0x1e2   :  { %v632_v60 = vsel %vm595_vm6, %v576_v50, %v578_v52  ;;  %768 = vmatprep.subr.bf16.mxu0 %v633_v57 }
 0x1e3   :  { %769 = vmatpush1.bf16.msra.mxu0 %v632_v60 }
 0x1e4   :  { %v582_v51 = vpop.permute.xlu0 %581 }
 0x1e5   :  { %v634_v61 = vsel %vm595_vm6, %v580_v55, %v582_v51  ;;  %v584_v28 = vpop.permute.xlu1 %583 }
 0x1e6   :  { %v635_v62 = vsel %vm595_vm6, %v582_v51, %v584_v28 }
 0x1e7   :  { %850 = vmatprep.subr.bf16.mxu1 %v635_v62 }
 0x1e8   :  { %851 = vmatpush1.bf16.msra.mxu1 %v634_v61  ;;  %v588_v63 = vpop.permute.xlu0 %587 }
 0x1e9   :  { %v590_v39 = vpop.permute.xlu1 %589 }
 0x1ea   :  { %v637_v40 = vsel %vm595_vm6, %v588_v63, %v590_v39 }
 0x1eb   :  { %770 = vmatprep.subr.bf16.mxu0 %v637_v40 }
 0x1ec   :  { %v586_v7 = vpop.permute.xlu0 %585 }
 0x1ed   :  { %v636_v8 = vsel %vm595_vm6, %v586_v7, %v588_v63  ;;  %v592_v42 = vpop.permute.xlu1 %591 }
 0x1ee   :  { %771 = vmatpush1.bf16.msra.mxu0 %v636_v8  ;;  %v638_v45 = vsel %vm595_vm6, %v590_v39, %v592_v42 }
 0x1f0   :  { %v594_v6 = vpop.permute.xlu0 %593 }
 0x1f1   :  { %783 = vmatmul.mubr.bf16.vlgmr.msra.gmra.mrb[0].mxu0 %v1010_v13  ;;  %v639_v44 = vsel %vm595_vm6, %v592_v42, %v594_v6 }
 0x1f2   :  { %852 = vmatprep.subr.bf16.mxu1 %v639_v44 }
 0x1f3   :  { %853 = vmatpush1.bf16.msra.mxu1 %v638_v45 }
 0x1f6   :  { %865 = vmatmul.mubr.bf16.vlgmr.msra.gmra.mrb[0].mxu1 %v1010_v13 }
 0x1fe   :  { %v690_v17 = vpop.permute.xlu1 %689 }
 0x2c4   :  { %v784_v22 = vpop.f32.mrb[0].mxu0 }
 0x2c5   :  { %v1018_v24 = vadd.f32 %v784_v22, %v690_v17  ;;  %v786_v32 = vpop.f32.mrb[1].mxu0 }
 0x2c6   :  { %v1019_v34 = vadd.f32 %v786_v32, %v690_v17  ;;  %v788_v36 = vpop.f32.mrb[2].mxu0 }
 0x2c7   :  { %v912_v41 = vmul.f32 %v1018_v24, %v899_v25  ;;  %v789_v18 = vpop.f32.mrb[3].mxu0 }
 0x2c8   :  { %v913_v19 = vmul.f32 %v1019_v34, %v903_v26 }
 0x2c9   :  { %v927_v29 = vmul.f32 %v1018_v24, %v912_v41  ;;  %v866_v16 = vpop.f32.mrb[0].mxu1  ;;  %v917_v46 = vsel %vm916_vm7, %v912_v41, 0.0 }
 0x2ca   :  { %v918_v47 = vsel %vm916_vm7, %v913_v19, 0.0  ;;  %v928_v27 = vmul.f32 %v1019_v34, %v913_v19  ;;  %v1020_v48 = vadd.f32 %v866_v16, %v690_v17  ;;  %v868_v37 = vpop.f32.mrb[1].mxu1 }
 0x2cb   :  { %v1021_v0 = vadd.f32 %v868_v37, %v690_v17  ;;  %v870_v2 = vpop.f32.mrb[2].mxu1  ;;  %v931_v3 = vsel %vm916_vm7, %v927_v29, 0.0  ;;  %v919_v15 = vadd.f32 %v918_v47, %v917_v46 }
 0x2cc   :  { %v932_v4 = vsel %vm916_vm7, %v928_v27, 0.0  ;;  %v914_v35 = vmul.f32 %v1020_v48, %v907_v43  ;;  %v871_v38 = vpop.f32.mrb[3].mxu1 }
 0x2cd   :  { %v915_v11 = vmul.f32 %v1021_v0, %v911_v33  ;;  %v933_v10 = vadd.f32 %v932_v4, %v931_v3 }
 0x2ce   :  { %v929_v1 = vmul.f32 %v1020_v48, %v914_v35  ;;  %v920_v49 = vsel %vm916_vm7, %v914_v35, 0.0 }
 0x2cf   :  { %v930_v14 = vmul.f32 %v1021_v0, %v915_v11  ;;  %v921_v52 = vadd.f32 %v920_v49, %v919_v15  ;;  %v922_v12 = vsel %vm916_vm7, %v915_v11, 0.0 }
 0x2d0   :  { %v934_v55 = vsel %vm916_vm7, %v929_v1, 0.0 }
 0x2d1   :  { %v923_v50 = vadd.f32 %v922_v12, %v921_v52  ;;  %v935_v57 = vadd.f32 %v934_v55, %v933_v10  ;;  %v936_v60 = vsel %vm916_vm7, %v930_v14, 0.0 }
 0x2d3   :  { %924 = vadd.xlane.f32.xlu0 %v923_v50  ;;  %v937_v51 = vadd.f32 %v936_v60, %v935_v57 }
 0x2d5   :  { %938 = vadd.xlane.f32.xlu1 %v937_v51 }
 0x360   :  { %v925_v61 = vpop.xlane.xlu0 %924 }
 0x361   :  { %v926_v28 = vmul.f32 0.00390625, %v925_v61 }
 0x362   :  { %v939_v62 = vpop.xlane.xlu1 %938 }
 0x363   :  { %v940_v63 = vmul.f32 0.00390625, %v939_v62  ;;  %v941_v39 = vmul.f32 %v926_v28, %v926_v28  ;;  %v943_v13 = vsub.f32 %v1018_v24, %v926_v28  ;;  %v944_v42 = vsub.f32 %v1019_v34, %v926_v28 }
 0x364   :  { %v945_v6 = vsub.f32 %v1020_v48, %v926_v28  ;;  %v946_v44 = vsub.f32 %v1021_v0, %v926_v28 }
 0x365   :  { %v942_v40 = vsub.f32 %v940_v63, %v941_v39 }
 0x367   :  { %v947_v7 = vmax.f32 %v942_v40, 0.0 }
 0x369   :  { %v948_v8 = vadd.f32 1e-05, %v947_v7 }
 0x36b   :  { %1075 = vrsqrt.f32 %v948_v8 }
 0x375   :  { %v1076_v45 = vpop.eup %1075 }
 0x376   :  { %v950_v54 = vmul.f32 %v1076_v45, %v943_v13  ;;  %v951_v21 = vmul.f32 %v1076_v45, %v944_v42  ;;  %v952_v56 = vmul.f32 %v1076_v45, %v945_v6  ;;  %v953_v31 = vmul.f32 %v1076_v45, %v946_v44 }
 0x378   :  { %vm955_vm8 = vcmp.ge.f32.partialorder %v950_v54, 0.0  ;;  %vm956_vm9 = vcmp.ge.f32.partialorder %v951_v21, 0.0  ;;  %vm957_vm10 = vcmp.ge.f32.partialorder %v952_v56, 0.0  ;;  %vm958_vm11 = vcmp.ge.f32.partialorder %v953_v31, 0.0 }
 0x379   :  { %v960_v9 = vmul.f32 %v959_v53, %v950_v54  ;;  %v961_v23 = vmul.f32 %v959_v53, %v951_v21  ;;  %v962_v20 = vmul.f32 %v959_v53, %v952_v56  ;;  %v963_v59 = vmul.f32 %v959_v53, %v953_v31 }
 0x37b   :  { %v964_v30 = vsel %vm955_vm8, %v950_v54, %v960_v9  ;;  %v965_v17 = vsel %vm956_vm9, %v951_v21, %v961_v23  ;;  %v966_v25 = vsel %vm957_vm10, %v952_v56, %v962_v20  ;;  %v967_v22 = vsel %vm958_vm11, %v953_v31, %v963_v59 }
 0x37c   :  { %v1016_v26 = vpack.c.bf16 %v965_v17, %v964_v30  ;;  %v1017_v5 = vpack.c.bf16 %v967_v22, %v966_v25 }
 0x37e   :  { %984 = vst [vmem:[#allocation8] sm:$0x77] %v1016_v26  ;;  %985 = vst [vmem:[#allocation8 + $0x8] sm:$0x77] %v1017_v5 }
 0x37f   :  { %1135 = shalt.err (!%p1132_p12)
}
 0x380   :  { %s1136_s11 = scalar_lea.hbm %s1854_s6, 256 }
 0x381   :  { %p1137_p13 = scmp.ne.s32.totalorder %s1854_s6, %s1136_s11  ;;  %p1140_p0 = scmp.lt.u32.totalorder %s1136_s11, %s1854_s6 }
 0x383   :  { %p1142_p1 = pnand %p1140_p0, %p1137_p13 }
 0x385   :  { %1145 = shalt.err (!%p1142_p1)
}
 0x386   :  { %995 = dma.vmem_to_hbm [thread:$0]  %s993_s8, 256, %s1854_s6, [#allocation5]  }
 0x387   :  { %1150 = dma.done.wait [#allocation5], 256  }
 0x388   :  { %1151 = vsyncadd [#allocation5], 4294967040 }
 0x389   :  { %999 = vsyncpa [#allocation4], 1 }
 0x38a   :  { %1000 = vsyncpa [#allocation7], 1 }
 0x38b   :  { %1001 = vsyncpa [#allocation5], 1 }

</bundles_post_ra>
